<compile_context>
chip_gen: v7x
topology: tpu7x:2x2x1
jax: 0.10.0
libtpu: 0.0.40
codegen_flags: <defaults>
</compile_context>

<pallas_src>
import functools

import jax
import jax.numpy as jnp
from jax.experimental import pallas as pl
from jax.experimental.pallas import tpu as pltpu


def resnet15_kernel(xt_ref, w1_ref, b1_ref, wmid_ref, bmid_ref,
                    w15t_ref, b15_ref, out_ref, *, t_step):
    x = xt_ref[...]                          # (d, tm)   batch on lanes
    w1 = w1_ref[...]                         # (d_in, d)
    d = x.shape[0]

    # --- Layer 1: K = d is tiny -> VPU broadcast FMAs, skip the MXU. -------
    acc = b1_ref[...]                        # (d_in, 1), broadcasts over lanes
    for k in range(d):                       # static unroll over input features
        acc = acc + w1[:, k:k + 1] * x[k:k + 1, :]
    y = jnp.maximum(acc, 0.0)                # (d_in, tm)

    # --- Layers 2..14: residual blocks, full-lane MXU matmuls. -------------
    n_mid = wmid_ref.shape[0]
    for l in range(n_mid):                   # static unroll (13 layers)
        h = jnp.dot(wmid_ref[l], y, preferred_element_type=jnp.float32)
        h = h + bmid_ref[l]                  # (d_in, tm) + (d_in, 1)
        y = y + t_step * jnp.maximum(h, 0.0)

    # --- Layer 15: d_in -> 1. VPU multiply + XLU sublane reduce; lane-dense
    # (1, tm) store. ---------------------------------------------------------
    out_ref[...] = (jnp.sum(w15t_ref[...] * y, axis=0, keepdims=True)
                    + b15_ref[...])          # (1, tm)


def resnet15_forward(X, params, t_step, *, tm=256):
    """Pallas equivalent of ResNet15.forward.  X has shape (..., d)."""
    W1, b1, Wmid, bmid, W15, b15 = params
    d_in, d = W1.shape
    lead_shape = X.shape[:-1]

    Xr = X.reshape(-1, d).astype(jnp.float32)
    N = Xr.shape[0]
    n_pad = int(pl.cdiv(max(N, 1), tm)) * tm
    if n_pad != N:
        Xr = jnp.pad(Xr, ((0, n_pad - N), (0, 0)))

    Xt = Xr.T                                 # (d, n_pad): batch on lane axis
    w15t = W15.T                              # (d_in, 1)
    b15r = b15.reshape(1, 1)

    kernel = functools.partial(resnet15_kernel, t_step=float(t_step))

    out = pl.pallas_call(
        kernel,
        out_shape=jax.ShapeDtypeStruct((1, n_pad), jnp.float32),
        grid_spec=pltpu.PrefetchScalarGridSpec(
            num_scalar_prefetch=0,
            grid=(n_pad // tm,),
            in_specs=[
                pl.BlockSpec((d, tm), lambda i: (0, i)),        # X^T tile
                pl.BlockSpec(W1.shape, lambda i: (0, 0)),       # resident weights
                pl.BlockSpec(b1.shape, lambda i: (0, 0)),
                pl.BlockSpec(Wmid.shape, lambda i: (0, 0, 0)),  # (13, d_in, d_in)
                pl.BlockSpec(bmid.shape, lambda i: (0, 0, 0)),  # (13, d_in, 1)
                pl.BlockSpec(w15t.shape, lambda i: (0, 0)),
                pl.BlockSpec(b15r.shape, lambda i: (0, 0)),
            ],
            out_specs=pl.BlockSpec((1, tm), lambda i: (0, i)),  # lane-dense slab
        ),
        compiler_params=pltpu.CompilerParams(
            dimension_semantics=("parallel",)),
    )(Xt, W1, b1, Wmid, bmid, w15t, b15r)

    return out[0, :N].reshape(lead_shape + (1,))


def init_params(key, d, d_in, n_mid=13):
    """Deterministic init matching torch.nn.Linear shapes (weights as (out,in))."""
    def lin(k, fan_in, fan_out):
        kw, kb = jax.random.split(k)
        bound = 1.0 / jnp.sqrt(jnp.float32(fan_in))
        W = jax.random.uniform(kw, (fan_out, fan_in), jnp.float32, -bound, bound)
        b = jax.random.uniform(kb, (fan_out, 1), jnp.float32, -bound, bound)
        return W, b

    ks = jax.random.split(key, n_mid + 2)
    W1, b1 = lin(ks[0], d, d_in)
    Wm, bm = [], []
    for i in range(n_mid):
        W, b = lin(ks[1 + i], d_in, d_in)
        Wm.append(W)
        bm.append(b)
    Wmid = jnp.stack(Wm)      # (13, d_in, d_in)
    bmid = jnp.stack(bm)      # (13, d_in, 1)
    W15, b15 = lin(ks[-1], d_in, 1)   # (1, d_in), (1, 1)
    return (W1, b1, Wmid, bmid, W15, b15)


def reference_forward(X, params, t_step):
    """Pure-JAX reference mirroring the PyTorch forward, for correctness."""
    W1, b1, Wmid, bmid, W15, b15 = params
    d = W1.shape[1]
    Xr = X.reshape(-1, d).astype(jnp.float32)
    Y = jnp.maximum(Xr @ W1.T + b1[:, 0], 0.0)
    for l in range(Wmid.shape[0]):
        Y = Y + t_step * jnp.maximum(Y @ Wmid[l].T + bmid[l, :, 0], 0.0)
    out = Y @ W15.T + b15[:, 0]
    return out.reshape(X.shape[:-1] + (1,))


if __name__ == "__main__":
    d, d_in, t_step = 3, 32, 0.1

    key = jax.random.PRNGKey(0)
    kp, kx = jax.random.split(key)
    params = init_params(kp, d, d_in)

    # Small example: leading dims (2, 4, 64) -> 512 flattened rows
    # -> grid of 2 parallel steps at tm=256 (keeps both v7x TensorCores busy).
    X = jax.random.normal(kx, (2, 4, 64, d), dtype=jnp.float32)

    out = resnet15_forward(X, params, t_step, tm=256)
    out = jax.block_until_ready(out)

    ref = reference_forward(X, params, t_step)
    assert out.shape == X.shape[:-1] + (1,)
    assert jnp.allclose(out, ref, atol=5e-3, rtol=5e-3), "mismatch vs reference"

    print("KERNEL_OK")
</pallas_src>

<mosaic_0001>
module attributes {stable_mosaic.version = 11 : i64} {
  func.func @resnet15_kernel(%arg0: i32, %arg1: memref<3x256xf32, #tpu.memory_space<vmem>>, %arg2: memref<32x3xf32, #tpu.memory_space<vmem>>, %arg3: memref<32x1xf32, #tpu.memory_space<vmem>>, %arg4: memref<13x32x32xf32, #tpu.memory_space<vmem>>, %arg5: memref<13x32x1xf32, #tpu.memory_space<vmem>>, %arg6: memref<32x1xf32, #tpu.memory_space<vmem>>, %arg7: memref<1x1xf32, #tpu.memory_space<vmem>>, %arg8: memref<1x256xf32, #tpu.memory_space<vmem>>) attributes {dimension_semantics = [#tpu.dimension_semantics<parallel>], iteration_bounds = array<i64: 2>, scalar_prefetch = 0 : i64, scratch_operands = 0 : i64, tpu.core_type = #tpu.core_type<tc>, window_params = [{transform_indices = @transform_0, window_bounds = array<i64: 3, 256>}, {pipeline_mode = #tpu.pipeline_mode<synchronous>, transform_indices = @transform_1, window_bounds = array<i64: 32, 3>}, {pipeline_mode = #tpu.pipeline_mode<synchronous>, transform_indices = @transform_2, window_bounds = array<i64: 32, 1>}, {pipeline_mode = #tpu.pipeline_mode<synchronous>, transform_indices = @transform_3, window_bounds = array<i64: 13, 32, 32>}, {pipeline_mode = #tpu.pipeline_mode<synchronous>, transform_indices = @transform_4, window_bounds = array<i64: 13, 32, 1>}, {pipeline_mode = #tpu.pipeline_mode<synchronous>, transform_indices = @transform_5, window_bounds = array<i64: 32, 1>}, {pipeline_mode = #tpu.pipeline_mode<synchronous>, transform_indices = @transform_6, window_bounds = array<i64: 1, 1>}, {transform_indices = @transform_7, window_bounds = array<i64: 1, 256>}]} {
    %c0 = arith.constant 0 : index
    %c0_0 = arith.constant 0 : index
    %0 = vector.load %arg1[%c0, %c0_0] : memref<3x256xf32, #tpu.memory_space<vmem>>, vector<3x256xf32>
    %c0_1 = arith.constant 0 : index
    %c0_2 = arith.constant 0 : index
    %1 = vector.load %arg2[%c0_1, %c0_2] : memref<32x3xf32, #tpu.memory_space<vmem>>, vector<32x3xf32>
    %c0_3 = arith.constant 0 : index
    %c0_4 = arith.constant 0 : index
    %2 = vector.load %arg3[%c0_3, %c0_4] : memref<32x1xf32, #tpu.memory_space<vmem>>, vector<32x1xf32>
    %3 = vector.extract_strided_slice %1 {offsets = [0, 0], sizes = [32, 1], strides = [1, 1]} : vector<32x3xf32> to vector<32x1xf32>
    %4 = vector.extract_strided_slice %0 {offsets = [0, 0], sizes = [1, 256], strides = [1, 1]} : vector<3x256xf32> to vector<1x256xf32>
    %5 = vector.broadcast %3 : vector<32x1xf32> to vector<32x256xf32>
    %6 = vector.broadcast %4 : vector<1x256xf32> to vector<32x256xf32>
    %7 = arith.mulf %5, %6 : vector<32x256xf32>
    %8 = vector.broadcast %2 : vector<32x1xf32> to vector<32x256xf32>
    %9 = arith.addf %8, %7 : vector<32x256xf32>
    %10 = vector.extract_strided_slice %1 {offsets = [0, 1], sizes = [32, 1], strides = [1, 1]} : vector<32x3xf32> to vector<32x1xf32>
    %11 = vector.extract_strided_slice %0 {offsets = [1, 0], sizes = [1, 256], strides = [1, 1]} : vector<3x256xf32> to vector<1x256xf32>
    %12 = vector.broadcast %10 : vector<32x1xf32> to vector<32x256xf32>
    %13 = vector.broadcast %11 : vector<1x256xf32> to vector<32x256xf32>
    %14 = arith.mulf %12, %13 : vector<32x256xf32>
    %15 = arith.addf %9, %14 : vector<32x256xf32>
    %16 = vector.extract_strided_slice %1 {offsets = [0, 2], sizes = [32, 1], strides = [1, 1]} : vector<32x3xf32> to vector<32x1xf32>
    %17 = vector.extract_strided_slice %0 {offsets = [2, 0], sizes = [1, 256], strides = [1, 1]} : vector<3x256xf32> to vector<1x256xf32>
    %18 = vector.broadcast %16 : vector<32x1xf32> to vector<32x256xf32>
    %19 = vector.broadcast %17 : vector<1x256xf32> to vector<32x256xf32>
    %20 = arith.mulf %18, %19 : vector<32x256xf32>
    %21 = arith.addf %15, %20 : vector<32x256xf32>
    %cst = arith.constant 0.000000e+00 : f32
    %22 = vector.broadcast %cst : f32 to vector<32x256xf32>
    %23 = arith.maximumf %21, %22 : vector<32x256xf32>
    %c0_5 = arith.constant 0 : index
    %c0_6 = arith.constant 0 : index
    %c0_7 = arith.constant 0 : index
    %24 = vector.load %arg4[%c0_5, %c0_6, %c0_7] : memref<13x32x32xf32, #tpu.memory_space<vmem>>, vector<1x32x32xf32>
    %25 = vector.shape_cast %24 : vector<1x32x32xf32> to vector<32x32xf32>
    %cst_8 = arith.constant dense<0.000000e+00> : vector<32x256xf32>
    %26 = tpu.matmul %25, %23, %cst_8 {dimension_numbers = #tpu.dot_dimension_numbers<[1], [0], [0], [1], [0, 0, 1, 1], [], []>} : vector<32x32xf32>, vector<32x256xf32>, vector<32x256xf32> -> vector<32x256xf32>
    %c0_9 = arith.constant 0 : index
    %c0_10 = arith.constant 0 : index
    %c0_11 = arith.constant 0 : index
    %27 = vector.load %arg5[%c0_9, %c0_10, %c0_11] : memref<13x32x1xf32, #tpu.memory_space<vmem>>, vector<1x32x1xf32>
    %28 = vector.shape_cast %27 : vector<1x32x1xf32> to vector<32x1xf32>
    %29 = vector.broadcast %28 : vector<32x1xf32> to vector<32x256xf32>
    %30 = arith.addf %26, %29 : vector<32x256xf32>
    %cst_12 = arith.constant 0.000000e+00 : f32
    %31 = vector.broadcast %cst_12 : f32 to vector<32x256xf32>
    %32 = arith.maximumf %30, %31 : vector<32x256xf32>
    %cst_13 = arith.constant 1.000000e-01 : f32
    %33 = vector.broadcast %cst_13 : f32 to vector<32x256xf32>
    %34 = arith.mulf %33, %32 : vector<32x256xf32>
    %35 = arith.addf %23, %34 : vector<32x256xf32>
    %c1 = arith.constant 1 : index
    %c0_14 = arith.constant 0 : index
    %c0_15 = arith.constant 0 : index
    %36 = vector.load %arg4[%c1, %c0_14, %c0_15] : memref<13x32x32xf32, #tpu.memory_space<vmem>>, vector<1x32x32xf32>
    %37 = vector.shape_cast %36 : vector<1x32x32xf32> to vector<32x32xf32>
    %cst_16 = arith.constant dense<0.000000e+00> : vector<32x256xf32>
    %38 = tpu.matmul %37, %35, %cst_16 {dimension_numbers = #tpu.dot_dimension_numbers<[1], [0], [0], [1], [0, 0, 1, 1], [], []>} : vector<32x32xf32>, vector<32x256xf32>, vector<32x256xf32> -> vector<32x256xf32>
    %c1_17 = arith.constant 1 : index
    %c0_18 = arith.constant 0 : index
    %c0_19 = arith.constant 0 : index
    %39 = vector.load %arg5[%c1_17, %c0_18, %c0_19] : memref<13x32x1xf32, #tpu.memory_space<vmem>>, vector<1x32x1xf32>
    %40 = vector.shape_cast %39 : vector<1x32x1xf32> to vector<32x1xf32>
    %41 = vector.broadcast %40 : vector<32x1xf32> to vector<32x256xf32>
    %42 = arith.addf %38, %41 : vector<32x256xf32>
    %cst_20 = arith.constant 0.000000e+00 : f32
    %43 = vector.broadcast %cst_20 : f32 to vector<32x256xf32>
    %44 = arith.maximumf %42, %43 : vector<32x256xf32>
    %cst_21 = arith.constant 1.000000e-01 : f32
    %45 = vector.broadcast %cst_21 : f32 to vector<32x256xf32>
    %46 = arith.mulf %45, %44 : vector<32x256xf32>
    %47 = arith.addf %35, %46 : vector<32x256xf32>
    %c2 = arith.constant 2 : index
    %c0_22 = arith.constant 0 : index
    %c0_23 = arith.constant 0 : index
    %48 = vector.load %arg4[%c2, %c0_22, %c0_23] : memref<13x32x32xf32, #tpu.memory_space<vmem>>, vector<1x32x32xf32>
    %49 = vector.shape_cast %48 : vector<1x32x32xf32> to vector<32x32xf32>
    %cst_24 = arith.constant dense<0.000000e+00> : vector<32x256xf32>
    %50 = tpu.matmul %49, %47, %cst_24 {dimension_numbers = #tpu.dot_dimension_numbers<[1], [0], [0], [1], [0, 0, 1, 1], [], []>} : vector<32x32xf32>, vector<32x256xf32>, vector<32x256xf32> -> vector<32x256xf32>
    %c2_25 = arith.constant 2 : index
    %c0_26 = arith.constant 0 : index
    %c0_27 = arith.constant 0 : index
    %51 = vector.load %arg5[%c2_25, %c0_26, %c0_27] : memref<13x32x1xf32, #tpu.memory_space<vmem>>, vector<1x32x1xf32>
    %52 = vector.shape_cast %51 : vector<1x32x1xf32> to vector<32x1xf32>
    %53 = vector.broadcast %52 : vector<32x1xf32> to vector<32x256xf32>
    %54 = arith.addf %50, %53 : vector<32x256xf32>
    %cst_28 = arith.constant 0.000000e+00 : f32
    %55 = vector.broadcast %cst_28 : f32 to vector<32x256xf32>
    %56 = arith.maximumf %54, %55 : vector<32x256xf32>
    %cst_29 = arith.constant 1.000000e-01 : f32
    %57 = vector.broadcast %cst_29 : f32 to vector<32x256xf32>
    %58 = arith.mulf %57, %56 : vector<32x256xf32>
    %59 = arith.addf %47, %58 : vector<32x256xf32>
    %c3 = arith.constant 3 : index
    %c0_30 = arith.constant 0 : index
    %c0_31 = arith.constant 0 : index
    %60 = vector.load %arg4[%c3, %c0_30, %c0_31] : memref<13x32x32xf32, #tpu.memory_space<vmem>>, vector<1x32x32xf32>
    %61 = vector.shape_cast %60 : vector<1x32x32xf32> to vector<32x32xf32>
    %cst_32 = arith.constant dense<0.000000e+00> : vector<32x256xf32>
    %62 = tpu.matmul %61, %59, %cst_32 {dimension_numbers = #tpu.dot_dimension_numbers<[1], [0], [0], [1], [0, 0, 1, 1], [], []>} : vector<32x32xf32>, vector<32x256xf32>, vector<32x256xf32> -> vector<32x256xf32>
    %c3_33 = arith.constant 3 : index
    %c0_34 = arith.constant 0 : index
    %c0_35 = arith.constant 0 : index
    %63 = vector.load %arg5[%c3_33, %c0_34, %c0_35] : memref<13x32x1xf32, #tpu.memory_space<vmem>>, vector<1x32x1xf32>
    %64 = vector.shape_cast %63 : vector<1x32x1xf32> to vector<32x1xf32>
    %65 = vector.broadcast %64 : vector<32x1xf32> to vector<32x256xf32>
    %66 = arith.addf %62, %65 : vector<32x256xf32>
    %cst_36 = arith.constant 0.000000e+00 : f32
    %67 = vector.broadcast %cst_36 : f32 to vector<32x256xf32>
    %68 = arith.maximumf %66, %67 : vector<32x256xf32>
    %cst_37 = arith.constant 1.000000e-01 : f32
    %69 = vector.broadcast %cst_37 : f32 to vector<32x256xf32>
    %70 = arith.mulf %69, %68 : vector<32x256xf32>
    %71 = arith.addf %59, %70 : vector<32x256xf32>
    %c4 = arith.constant 4 : index
    %c0_38 = arith.constant 0 : index
    %c0_39 = arith.constant 0 : index
    %72 = vector.load %arg4[%c4, %c0_38, %c0_39] : memref<13x32x32xf32, #tpu.memory_space<vmem>>, vector<1x32x32xf32>
    %73 = vector.shape_cast %72 : vector<1x32x32xf32> to vector<32x32xf32>
    %cst_40 = arith.constant dense<0.000000e+00> : vector<32x256xf32>
    %74 = tpu.matmul %73, %71, %cst_40 {dimension_numbers = #tpu.dot_dimension_numbers<[1], [0], [0], [1], [0, 0, 1, 1], [], []>} : vector<32x32xf32>, vector<32x256xf32>, vector<32x256xf32> -> vector<32x256xf32>
    %c4_41 = arith.constant 4 : index
    %c0_42 = arith.constant 0 : index
    %c0_43 = arith.constant 0 : index
    %75 = vector.load %arg5[%c4_41, %c0_42, %c0_43] : memref<13x32x1xf32, #tpu.memory_space<vmem>>, vector<1x32x1xf32>
    %76 = vector.shape_cast %75 : vector<1x32x1xf32> to vector<32x1xf32>
    %77 = vector.broadcast %76 : vector<32x1xf32> to vector<32x256xf32>
    %78 = arith.addf %74, %77 : vector<32x256xf32>
    %cst_44 = arith.constant 0.000000e+00 : f32
    %79 = vector.broadcast %cst_44 : f32 to vector<32x256xf32>
    %80 = arith.maximumf %78, %79 : vector<32x256xf32>
    %cst_45 = arith.constant 1.000000e-01 : f32
    %81 = vector.broadcast %cst_45 : f32 to vector<32x256xf32>
    %82 = arith.mulf %81, %80 : vector<32x256xf32>
    %83 = arith.addf %71, %82 : vector<32x256xf32>
    %c5 = arith.constant 5 : index
    %c0_46 = arith.constant 0 : index
    %c0_47 = arith.constant 0 : index
    %84 = vector.load %arg4[%c5, %c0_46, %c0_47] : memref<13x32x32xf32, #tpu.memory_space<vmem>>, vector<1x32x32xf32>
    %85 = vector.shape_cast %84 : vector<1x32x32xf32> to vector<32x32xf32>
    %cst_48 = arith.constant dense<0.000000e+00> : vector<32x256xf32>
    %86 = tpu.matmul %85, %83, %cst_48 {dimension_numbers = #tpu.dot_dimension_numbers<[1], [0], [0], [1], [0, 0, 1, 1], [], []>} : vector<32x32xf32>, vector<32x256xf32>, vector<32x256xf32> -> vector<32x256xf32>
    %c5_49 = arith.constant 5 : index
    %c0_50 = arith.constant 0 : index
    %c0_51 = arith.constant 0 : index
    %87 = vector.load %arg5[%c5_49, %c0_50, %c0_51] : memref<13x32x1xf32, #tpu.memory_space<vmem>>, vector<1x32x1xf32>
    %88 = vector.shape_cast %87 : vector<1x32x1xf32> to vector<32x1xf32>
    %89 = vector.broadcast %88 : vector<32x1xf32> to vector<32x256xf32>
    %90 = arith.addf %86, %89 : vector<32x256xf32>
    %cst_52 = arith.constant 0.000000e+00 : f32
    %91 = vector.broadcast %cst_52 : f32 to vector<32x256xf32>
    %92 = arith.maximumf %90, %91 : vector<32x256xf32>
    %cst_53 = arith.constant 1.000000e-01 : f32
    %93 = vector.broadcast %cst_53 : f32 to vector<32x256xf32>
    %94 = arith.mulf %93, %92 : vector<32x256xf32>
    %95 = arith.addf %83, %94 : vector<32x256xf32>
    %c6 = arith.constant 6 : index
    %c0_54 = arith.constant 0 : index
    %c0_55 = arith.constant 0 : index
    %96 = vector.load %arg4[%c6, %c0_54, %c0_55] : memref<13x32x32xf32, #tpu.memory_space<vmem>>, vector<1x32x32xf32>
    %97 = vector.shape_cast %96 : vector<1x32x32xf32> to vector<32x32xf32>
    %cst_56 = arith.constant dense<0.000000e+00> : vector<32x256xf32>
    %98 = tpu.matmul %97, %95, %cst_56 {dimension_numbers = #tpu.dot_dimension_numbers<[1], [0], [0], [1], [0, 0, 1, 1], [], []>} : vector<32x32xf32>, vector<32x256xf32>, vector<32x256xf32> -> vector<32x256xf32>
    %c6_57 = arith.constant 6 : index
    %c0_58 = arith.constant 0 : index
    %c0_59 = arith.constant 0 : index
    %99 = vector.load %arg5[%c6_57, %c0_58, %c0_59] : memref<13x32x1xf32, #tpu.memory_space<vmem>>, vector<1x32x1xf32>
    %100 = vector.shape_cast %99 : vector<1x32x1xf32> to vector<32x1xf32>
    %101 = vector.broadcast %100 : vector<32x1xf32> to vector<32x256xf32>
    %102 = arith.addf %98, %101 : vector<32x256xf32>
    %cst_60 = arith.constant 0.000000e+00 : f32
    %103 = vector.broadcast %cst_60 : f32 to vector<32x256xf32>
    %104 = arith.maximumf %102, %103 : vector<32x256xf32>
    %cst_61 = arith.constant 1.000000e-01 : f32
    %105 = vector.broadcast %cst_61 : f32 to vector<32x256xf32>
    %106 = arith.mulf %105, %104 : vector<32x256xf32>
    %107 = arith.addf %95, %106 : vector<32x256xf32>
    %c7 = arith.constant 7 : index
    %c0_62 = arith.constant 0 : index
    %c0_63 = arith.constant 0 : index
    %108 = vector.load %arg4[%c7, %c0_62, %c0_63] : memref<13x32x32xf32, #tpu.memory_space<vmem>>, vector<1x32x32xf32>
    %109 = vector.shape_cast %108 : vector<1x32x32xf32> to vector<32x32xf32>
    %cst_64 = arith.constant dense<0.000000e+00> : vector<32x256xf32>
    %110 = tpu.matmul %109, %107, %cst_64 {dimension_numbers = #tpu.dot_dimension_numbers<[1], [0], [0], [1], [0, 0, 1, 1], [], []>} : vector<32x32xf32>, vector<32x256xf32>, vector<32x256xf32> -> vector<32x256xf32>
    %c7_65 = arith.constant 7 : index
    %c0_66 = arith.constant 0 : index
    %c0_67 = arith.constant 0 : index
    %111 = vector.load %arg5[%c7_65, %c0_66, %c0_67] : memref<13x32x1xf32, #tpu.memory_space<vmem>>, vector<1x32x1xf32>
    %112 = vector.shape_cast %111 : vector<1x32x1xf32> to vector<32x1xf32>
    %113 = vector.broadcast %112 : vector<32x1xf32> to vector<32x256xf32>
    %114 = arith.addf %110, %113 : vector<32x256xf32>
    %cst_68 = arith.constant 0.000000e+00 : f32
    %115 = vector.broadcast %cst_68 : f32 to vector<32x256xf32>
    %116 = arith.maximumf %114, %115 : vector<32x256xf32>
    %cst_69 = arith.constant 1.000000e-01 : f32
    %117 = vector.broadcast %cst_69 : f32 to vector<32x256xf32>
    %118 = arith.mulf %117, %116 : vector<32x256xf32>
    %119 = arith.addf %107, %118 : vector<32x256xf32>
    %c8 = arith.constant 8 : index
    %c0_70 = arith.constant 0 : index
    %c0_71 = arith.constant 0 : index
    %120 = vector.load %arg4[%c8, %c0_70, %c0_71] : memref<13x32x32xf32, #tpu.memory_space<vmem>>, vector<1x32x32xf32>
    %121 = vector.shape_cast %120 : vector<1x32x32xf32> to vector<32x32xf32>
    %cst_72 = arith.constant dense<0.000000e+00> : vector<32x256xf32>
    %122 = tpu.matmul %121, %119, %cst_72 {dimension_numbers = #tpu.dot_dimension_numbers<[1], [0], [0], [1], [0, 0, 1, 1], [], []>} : vector<32x32xf32>, vector<32x256xf32>, vector<32x256xf32> -> vector<32x256xf32>
    %c8_73 = arith.constant 8 : index
    %c0_74 = arith.constant 0 : index
    %c0_75 = arith.constant 0 : index
    %123 = vector.load %arg5[%c8_73, %c0_74, %c0_75] : memref<13x32x1xf32, #tpu.memory_space<vmem>>, vector<1x32x1xf32>
    %124 = vector.shape_cast %123 : vector<1x32x1xf32> to vector<32x1xf32>
    %125 = vector.broadcast %124 : vector<32x1xf32> to vector<32x256xf32>
    %126 = arith.addf %122, %125 : vector<32x256xf32>
    %cst_76 = arith.constant 0.000000e+00 : f32
    %127 = vector.broadcast %cst_76 : f32 to vector<32x256xf32>
    %128 = arith.maximumf %126, %127 : vector<32x256xf32>
    %cst_77 = arith.constant 1.000000e-01 : f32
    %129 = vector.broadcast %cst_77 : f32 to vector<32x256xf32>
    %130 = arith.mulf %129, %128 : vector<32x256xf32>
    %131 = arith.addf %119, %130 : vector<32x256xf32>
    %c9 = arith.constant 9 : index
    %c0_78 = arith.constant 0 : index
    %c0_79 = arith.constant 0 : index
    %132 = vector.load %arg4[%c9, %c0_78, %c0_79] : memref<13x32x32xf32, #tpu.memory_space<vmem>>, vector<1x32x32xf32>
    %133 = vector.shape_cast %132 : vector<1x32x32xf32> to vector<32x32xf32>
    %cst_80 = arith.constant dense<0.000000e+00> : vector<32x256xf32>
    %134 = tpu.matmul %133, %131, %cst_80 {dimension_numbers = #tpu.dot_dimension_numbers<[1], [0], [0], [1], [0, 0, 1, 1], [], []>} : vector<32x32xf32>, vector<32x256xf32>, vector<32x256xf32> -> vector<32x256xf32>
    %c9_81 = arith.constant 9 : index
    %c0_82 = arith.constant 0 : index
    %c0_83 = arith.constant 0 : index
    %135 = vector.load %arg5[%c9_81, %c0_82, %c0_83] : memref<13x32x1xf32, #tpu.memory_space<vmem>>, vector<1x32x1xf32>
    %136 = vector.shape_cast %135 : vector<1x32x1xf32> to vector<32x1xf32>
    %137 = vector.broadcast %136 : vector<32x1xf32> to vector<32x256xf32>
    %138 = arith.addf %134, %137 : vector<32x256xf32>
    %cst_84 = arith.constant 0.000000e+00 : f32
    %139 = vector.broadcast %cst_84 : f32 to vector<32x256xf32>
    %140 = arith.maximumf %138, %139 : vector<32x256xf32>
    %cst_85 = arith.constant 1.000000e-01 : f32
    %141 = vector.broadcast %cst_85 : f32 to vector<32x256xf32>
    %142 = arith.mulf %141, %140 : vector<32x256xf32>
    %143 = arith.addf %131, %142 : vector<32x256xf32>
    %c10 = arith.constant 10 : index
    %c0_86 = arith.constant 0 : index
    %c0_87 = arith.constant 0 : index
    %144 = vector.load %arg4[%c10, %c0_86, %c0_87] : memref<13x32x32xf32, #tpu.memory_space<vmem>>, vector<1x32x32xf32>
    %145 = vector.shape_cast %144 : vector<1x32x32xf32> to vector<32x32xf32>
    %cst_88 = arith.constant dense<0.000000e+00> : vector<32x256xf32>
    %146 = tpu.matmul %145, %143, %cst_88 {dimension_numbers = #tpu.dot_dimension_numbers<[1], [0], [0], [1], [0, 0, 1, 1], [], []>} : vector<32x32xf32>, vector<32x256xf32>, vector<32x256xf32> -> vector<32x256xf32>
    %c10_89 = arith.constant 10 : index
    %c0_90 = arith.constant 0 : index
    %c0_91 = arith.constant 0 : index
    %147 = vector.load %arg5[%c10_89, %c0_90, %c0_91] : memref<13x32x1xf32, #tpu.memory_space<vmem>>, vector<1x32x1xf32>
    %148 = vector.shape_cast %147 : vector<1x32x1xf32> to vector<32x1xf32>
    %149 = vector.broadcast %148 : vector<32x1xf32> to vector<32x256xf32>
    %150 = arith.addf %146, %149 : vector<32x256xf32>
    %cst_92 = arith.constant 0.000000e+00 : f32
    %151 = vector.broadcast %cst_92 : f32 to vector<32x256xf32>
    %152 = arith.maximumf %150, %151 : vector<32x256xf32>
    %cst_93 = arith.constant 1.000000e-01 : f32
    %153 = vector.broadcast %cst_93 : f32 to vector<32x256xf32>
    %154 = arith.mulf %153, %152 : vector<32x256xf32>
    %155 = arith.addf %143, %154 : vector<32x256xf32>
    %c11 = arith.constant 11 : index
    %c0_94 = arith.constant 0 : index
    %c0_95 = arith.constant 0 : index
    %156 = vector.load %arg4[%c11, %c0_94, %c0_95] : memref<13x32x32xf32, #tpu.memory_space<vmem>>, vector<1x32x32xf32>
    %157 = vector.shape_cast %156 : vector<1x32x32xf32> to vector<32x32xf32>
    %cst_96 = arith.constant dense<0.000000e+00> : vector<32x256xf32>
    %158 = tpu.matmul %157, %155, %cst_96 {dimension_numbers = #tpu.dot_dimension_numbers<[1], [0], [0], [1], [0, 0, 1, 1], [], []>} : vector<32x32xf32>, vector<32x256xf32>, vector<32x256xf32> -> vector<32x256xf32>
    %c11_97 = arith.constant 11 : index
    %c0_98 = arith.constant 0 : index
    %c0_99 = arith.constant 0 : index
    %159 = vector.load %arg5[%c11_97, %c0_98, %c0_99] : memref<13x32x1xf32, #tpu.memory_space<vmem>>, vector<1x32x1xf32>
    %160 = vector.shape_cast %159 : vector<1x32x1xf32> to vector<32x1xf32>
    %161 = vector.broadcast %160 : vector<32x1xf32> to vector<32x256xf32>
    %162 = arith.addf %158, %161 : vector<32x256xf32>
    %cst_100 = arith.constant 0.000000e+00 : f32
    %163 = vector.broadcast %cst_100 : f32 to vector<32x256xf32>
    %164 = arith.maximumf %162, %163 : vector<32x256xf32>
    %cst_101 = arith.constant 1.000000e-01 : f32
    %165 = vector.broadcast %cst_101 : f32 to vector<32x256xf32>
    %166 = arith.mulf %165, %164 : vector<32x256xf32>
    %167 = arith.addf %155, %166 : vector<32x256xf32>
    %c12 = arith.constant 12 : index
    %c0_102 = arith.constant 0 : index
    %c0_103 = arith.constant 0 : index
    %168 = vector.load %arg4[%c12, %c0_102, %c0_103] : memref<13x32x32xf32, #tpu.memory_space<vmem>>, vector<1x32x32xf32>
    %169 = vector.shape_cast %168 : vector<1x32x32xf32> to vector<32x32xf32>
    %cst_104 = arith.constant dense<0.000000e+00> : vector<32x256xf32>
    %170 = tpu.matmul %169, %167, %cst_104 {dimension_numbers = #tpu.dot_dimension_numbers<[1], [0], [0], [1], [0, 0, 1, 1], [], []>} : vector<32x32xf32>, vector<32x256xf32>, vector<32x256xf32> -> vector<32x256xf32>
    %c12_105 = arith.constant 12 : index
    %c0_106 = arith.constant 0 : index
    %c0_107 = arith.constant 0 : index
    %171 = vector.load %arg5[%c12_105, %c0_106, %c0_107] : memref<13x32x1xf32, #tpu.memory_space<vmem>>, vector<1x32x1xf32>
    %172 = vector.shape_cast %171 : vector<1x32x1xf32> to vector<32x1xf32>
    %173 = vector.broadcast %172 : vector<32x1xf32> to vector<32x256xf32>
    %174 = arith.addf %170, %173 : vector<32x256xf32>
    %cst_108 = arith.constant 0.000000e+00 : f32
    %175 = vector.broadcast %cst_108 : f32 to vector<32x256xf32>
    %176 = arith.maximumf %174, %175 : vector<32x256xf32>
    %cst_109 = arith.constant 1.000000e-01 : f32
    %177 = vector.broadcast %cst_109 : f32 to vector<32x256xf32>
    %178 = arith.mulf %177, %176 : vector<32x256xf32>
    %179 = arith.addf %167, %178 : vector<32x256xf32>
    %c0_110 = arith.constant 0 : index
    %c0_111 = arith.constant 0 : index
    %180 = vector.load %arg6[%c0_110, %c0_111] : memref<32x1xf32, #tpu.memory_space<vmem>>, vector<32x1xf32>
    %181 = vector.broadcast %180 : vector<32x1xf32> to vector<32x256xf32>
    %182 = arith.mulf %181, %179 : vector<32x256xf32>
    %cst_112 = arith.constant dense<0.000000e+00> : vector<256xf32>
    %183 = vector.multi_reduction <add>, %182, %cst_112 [0] : vector<32x256xf32> to vector<256xf32>
    %184 = vector.shape_cast %183 : vector<256xf32> to vector<1x256xf32>
    %c0_113 = arith.constant 0 : index
    %c0_114 = arith.constant 0 : index
    %185 = vector.load %arg7[%c0_113, %c0_114] : memref<1x1xf32, #tpu.memory_space<vmem>>, vector<1x1xf32>
    %186 = vector.broadcast %185 : vector<1x1xf32> to vector<1x256xf32>
    %187 = arith.addf %184, %186 : vector<1x256xf32>
    %c0_115 = arith.constant 0 : index
    %c0_116 = arith.constant 0 : index
    %188 = vector.load %arg8[%c0_115, %c0_116] : memref<1x256xf32, #tpu.memory_space<vmem>>, vector<1x256xf32>
    tpu.vector_store %arg8[%c0_115, %c0_116], %187 {strides = array<i32>} : memref<1x256xf32, #tpu.memory_space<vmem>>, vector<1x256xf32>,
    return
  }
  func.func @transform_0(%arg0: i32) -> (i32, i32) {
    %c0_i32 = arith.constant 0 : i32
    %c0_i32_0 = arith.constant 0 : i32
    return %c0_i32, %arg0 : i32, i32
  }
  func.func @transform_1(%arg0: i32) -> (i32, i32) {
    %c0_i32 = arith.constant 0 : i32
    %c0_i32_0 = arith.constant 0 : i32
    %c0_i32_1 = arith.constant 0 : i32
    return %c0_i32, %c0_i32_0 : i32, i32
  }
  func.func @transform_2(%arg0: i32) -> (i32, i32) {
    %c0_i32 = arith.constant 0 : i32
    %c0_i32_0 = arith.constant 0 : i32
    %c0_i32_1 = arith.constant 0 : i32
    return %c0_i32, %c0_i32_0 : i32, i32
  }
  func.func @transform_3(%arg0: i32) -> (i32, i32, i32) {
    %c0_i32 = arith.constant 0 : i32
    %c0_i32_0 = arith.constant 0 : i32
    %c0_i32_1 = arith.constant 0 : i32
    %c0_i32_2 = arith.constant 0 : i32
    return %c0_i32, %c0_i32_0, %c0_i32_1 : i32, i32, i32
  }
  func.func @transform_4(%arg0: i32) -> (i32, i32, i32) {
    %c0_i32 = arith.constant 0 : i32
    %c0_i32_0 = arith.constant 0 : i32
    %c0_i32_1 = arith.constant 0 : i32
    %c0_i32_2 = arith.constant 0 : i32
    return %c0_i32, %c0_i32_0, %c0_i32_1 : i32, i32, i32
  }
  func.func @transform_5(%arg0: i32) -> (i32, i32) {
    %c0_i32 = arith.constant 0 : i32
    %c0_i32_0 = arith.constant 0 : i32
    %c0_i32_1 = arith.constant 0 : i32
    return %c0_i32, %c0_i32_0 : i32, i32
  }
  func.func @transform_6(%arg0: i32) -> (i32, i32) {
    %c0_i32 = arith.constant 0 : i32
    %c0_i32_0 = arith.constant 0 : i32
    %c0_i32_1 = arith.constant 0 : i32
    return %c0_i32, %c0_i32_0 : i32, i32
  }
  func.func @transform_7(%arg0: i32) -> (i32, i32) {
    %c0_i32 = arith.constant 0 : i32
    %c0_i32_0 = arith.constant 0 : i32
    return %c0_i32, %arg0 : i32, i32
  }
}

</mosaic_0001>

<bundles_post_ra>
// kernel: tpu_custom_call.1
= control target key start
LH: loop header
LB: loop body
LE: loop exit
PB: predicated region body
PF: predicated region fallthrough
CT: control target
= control target key end

     0   :  { %s4089_s0 = inlined_call_operand.vmem [shape: f32[3,512], index: 0, kind: input, shape index: {}]   ;;  %s4090_s1 = inlined_call_operand.vmem [shape: f32[32,3], index: 1, kind: input, shape index: {}]   ;;  %s4091_s2 = inlined_call_operand.vmem [shape: f32[32,1], index: 2, kind: input, shape index: {}]   ;;  %s4092_s3 = inlined_call_operand.vmem [shape: f32[13,32,32], index: 3, kind: input, shape index: {}]   ;;  %s4093_s4 = inlined_call_operand.vmem [shape: f32[13,32,1], index: 4, kind: input, shape index: {}]   ;;  %s4094_s5 = inlined_call_operand.vmem [shape: f32[32,1], index: 5, kind: input, shape index: {}]   ;;  %s4095_s6 = inlined_call_operand.<no memory space> [shape: f32[1,1], index: 6, kind: input, shape index: {}]   ;;  %s4096_s7 = inlined_call_operand.hbm [shape: f32[1,512], index: 7, kind: output, shape index: {}]  }
   0x1   :  { %v12_v0 = vstv %s4095_s6 }
   0x2   :  { %13 = vst [vmem:[#allocation2] sm:$0x1] %v12_v0 }
   0x3   :  { %14 = vsyncpa [#allocation4], 0 }
   0x4   :  { %16 = vsyncpa [#allocation4 + $0x1], 0  ;;  %s3085_s26 = smov 0   ;;  %s3087_s27 = smov 0  }
   0x5   :  { %s3089_s28 = smov 0   ;;  %s3091_s29 = smov 0  }
   0x6 LB: > { %s3106_s6 = sadd.s32 4294967295, %s3034_s29   ;;  %s2647_s30 = sadd.s32 4294967294, %s3034_s29   ;;  %s3034_s29 = sphi %s3091_s29, %s4102_s29   ;;  %s3030_s28 = sphi %s3089_s28, %s4101_s28   ;;  %s3026_s27 = sphi %s3087_s27, %s4100_s27   ;;  %s3022_s26 = sphi %s3085_s26, %s4099_s26  }
   0x7   : > { %s3110_s8 = sadd.s32 1, %s3034_s29   ;;  %s181_s9 = sadd.s32 1, %s3030_s28 }
   0x8   : > { %s178_s10 = ssub.s32 %s3034_s29, %s3110_s8  ;;  %p191_p0 = scmp.ne.s32.totalorder %s3030_s28, %s3026_s27 }
   0x9   : > { %p179_p1 = scmp.eq.s32.totalorder %s178_s10, 0  ;;  %p192_p2 = scmp.eq.s32.totalorder %s3106_s6, 1 }
   0xa   : > { %p197_p3 = scmp.ne.s32.totalorder %s3026_s27, %s3022_s26  ;;  %p198_p4 = scmp.eq.s32.totalorder %s2647_s30, 1 }
   0xb   : > { %s3121_s11 = scalar_select %p179_p1, %s3030_s28, %s181_s9  }
   0xc   : > { %p3123_p5 = por %p192_p2, %p191_p0  ;;  %p3127_p6 = por %p198_p4, %p197_p3 }
   0xd   : > { %p2650_p7 = scmp.ge.s32.totalorder %s3034_s29, 1  ;;  %p243_p8 = scmp.lt.s32.totalorder %s3034_s29, 3 }
   0xf   : > { %p244_p9 = pnand %p2650_p7, %p243_p8 }
  0x10   : > { %v287_v1 = vld [vmem:[%s4091_s2] sm:$0xff] (!%p244_p9)  ;;  %v3036_v3 = vmov (!%p244_p9), 0   ;;  %v288_v4 = vld [vmem:[%s4091_s2 + $0x8] sm:$0xff] (!%p244_p9)  ;;  %v286_v6 = vld [vmem:[%s4090_s1 + $0x18] sm:$0xff] (!%p244_p9)  ;;  %v3037_v7 = vmov (!%p244_p9), 1   ;;  %v3038_v10 = vmov (!%p244_p9), 2   ;;  %v312_v55 = vlaneseq (!%p244_p9) }
  0x11   : > { %247 = sbr.rel (%p244_p9) target bundleno = 3331 (0xd03), region = 48  ;;  %v283_v2 = vld [vmem:[%s4090_s1] sm:$0xff] (!%p244_p9)  ;;  %2961 = vset.pattern.permute.xlu1 (!%p244_p9), %v3036_v3  ;;  %2960 = vset.pattern.permute.xlu0 (!%p244_p9), %v3036_v3  ;;  %v284_v5 = vld [vmem:[%s4090_s1 + $0x8] sm:$0xff] (!%p244_p9)  ;;  %v289_v8 = vld [vmem:[%s4091_s2 + $0x10] sm:$0xff] (!%p244_p9)  ;;  %v3039_v18 = vmov (!%p244_p9), 0.0   ;;  %s2652_s16 = sshll.u32 (!%p244_p9), %s3106_s6, 1 }
  0x12   : > { %340 = vperm.xlu1 (!%p244_p9), %2961, %v287_v1   ;;  %293 = vperm.xlu0 (!%p244_p9), %2960, %v283_v2   ;;  %v285_v9 = vld [vmem:[%s4090_s1 + $0x10] sm:$0xff] (!%p244_p9)  ;;  %v290_v11 = vld [vmem:[%s4091_s2 + $0x18] sm:$0xff] (!%p244_p9)  ;;  %v478_v13 = vld [vmem:[%s4093_s4] sm:$0xff] (!%p244_p9)  ;;  %p276_p10 = scmp.lt.s32.totalorder (!%p244_p9), %s2652_s16, 3  ;;  %v3293_v58 = vshrl.u32 (!%p244_p9), %v312_v55, 7  ;;  %vm502_vm0 = vcmask (!%p244_p9), 261120  }
  0x13   : > { %v480_v12 = vld [vmem:[%s4093_s4 + $0x10] sm:$0xff] (!%p244_p9)  ;;  %v2663_v14 = vld [vmem:[%s4093_s4 + $0x28] sm:$0xff] (!%p244_p9)  ;;  %v2665_v16 = vld [vmem:[%s4093_s4 + $0x38] sm:$0xff] (!%p244_p9)  ;;  %579 = vmatprep.mubr.f32.mxu0 (!%p244_p9), %v3039_v18  ;;  %591 = vmatprep.mubr.f32.mxu1 (!%p244_p9), %v3039_v18  ;;  %s272_s30 = sand.u32 (!%p244_p9), 1, %s3026_s27   ;;  %s2807_s10 = sshll.u32 (!%p244_p9), %s3106_s6, 5  ;;  %vm2570_vm1 = vcmp.lt.s32.totalorder (!%p244_p9), %v312_v55, 256 }
  0x14   : > { %v479_v15 = vld [vmem:[%s4093_s4 + $0x8] sm:$0xff] (!%p244_p9)  ;;  %v481_v17 = vld [vmem:[%s4093_s4 + $0x18] sm:$0xff] (!%p244_p9)  ;;  %v2662_v20 = vld [vmem:[%s4093_s4 + $0x20] sm:$0xff] (!%p244_p9)  ;;  %v3305_v63 = vsub.s32 (!%p244_p9), 0, %v3293_v58  ;;  %v318_v0 = vsub.s32 (!%p244_p9), 4, %v3293_v58  ;;  %s4047_s19 = scalar_lea.hbm (!%p244_p9), %s4096_s7, %s2807_s10  ;;  %s3041_s6 = smov (!%p244_p9), [#allocation3]  }
  0x15   : > { %v2675_v19 = vld [vmem:[%s4093_s4 + $0x48] sm:$0xff] (!%p244_p9)  ;;  %v2677_v21 = vld [vmem:[%s4093_s4 + $0x58] sm:$0xff] (!%p244_p9)  ;;  %v2664_v22 = vld [vmem:[%s4093_s4 + $0x30] sm:$0xff] (!%p244_p9)  ;;  %s2976_s21 = sshll.u32 (!%p244_p9), %s3041_s6, 4  ;;  %s2977_s21 = int_to_ptr.vmem [resolvable:$false] %s2976_s21 }
  0x16   : > { %345 = vperm.xlu1 (!%p244_p9), %2961, %v288_v4   ;;  %298 = vperm.xlu0 (!%p244_p9), %2960, %v284_v5   ;;  %v2687_v23 = vld [vmem:[%s4093_s4 + $0x68] sm:$0xff] (!%p244_p9)  ;;  %v2674_v24 = vld [vmem:[%s4093_s4 + $0x40] sm:$0xff] (!%p244_p9)  ;;  %v2689_v25 = vld [vmem:[%s4093_s4 + $0x78] sm:$0xff] (!%p244_p9)  ;;  %s2978_s22 = scalar_lea.vmem (!%p244_p9), %s2977_s21, 64 }
  0x17   : > { %v2676_v26 = vld [vmem:[%s4093_s4 + $0x50] sm:$0xff] (!%p244_p9)  ;;  %v2699_v27 = vld [vmem:[%s4093_s4 + $0x88] sm:$0xff] (!%p244_p9)  ;;  %v2686_v28 = vld [vmem:[%s4093_s4 + $0x60] sm:$0xff] (!%p244_p9) }
  0x18   : > { %v2701_v29 = vld [vmem:[%s4093_s4 + $0x98] sm:$0xff]  ;;  %v2688_v30 = vld [vmem:[%s4093_s4 + $0x70] sm:$0xff]  ;;  %v2711_v31 = vld [vmem:[%s4093_s4 + $0xa8] sm:$0xff]  ;;  %s4104_s16 = smov (!%p276_p10, %s2652_s16), 3 }
  0x19   : > { %v2698_v32 = vld [vmem:[%s4093_s4 + $0x80] sm:$0xff]  ;;  %v2713_v33 = vld [vmem:[%s4093_s4 + $0xb8] sm:$0xff]  ;;  %v2700_v34 = vld [vmem:[%s4093_s4 + $0x90] sm:$0xff]  ;;  %s2653_s9 = sshll.u32 %s4104_s16, 2 }
  0x1a   : > { %2962 = vset.pattern.permute.xlu1 %v3037_v7  ;;  %308 = vperm.xlu0 %2960, %v286_v6   ;;  %v2723_v35 = vld [vmem:[%s4093_s4 + $0xc8] sm:$0xff]  ;;  %v2710_v36 = vld [vmem:[%s4093_s4 + $0xa0] sm:$0xff]  ;;  %v2725_v37 = vld [vmem:[%s4093_s4 + $0xd8] sm:$0xff]  ;;  %s279_s20 = scalar_lea.vmem %s4089_s0, %s2653_s9  ;;  %s2651_s9 = sshll.u32 %s272_s30, 1 }
  0x1b   : > { %371 = vperm.xlu1 %2962, %v284_v5   ;;  %v2712_v38 = vld [vmem:[%s4093_s4 + $0xb0] sm:$0xff]  ;;  %v2735_v39 = vld [vmem:[%s4093_s4 + $0xe8] sm:$0xff]  ;;  %v2722_v40 = vld [vmem:[%s4093_s4 + $0xc0] sm:$0xff]  ;;  %s274_s14 = scalar_lea.vmem [#allocation3], %s2651_s9 }
  0x1c   : > { %v2737_v41 = vld [vmem:[%s4093_s4 + $0xf8] sm:$0xff]  ;;  %v2724_v42 = vld [vmem:[%s4093_s4 + $0xd0] sm:$0xff]  ;;  %v2747_v43 = vld [vmem:[%s4093_s4 + $0x108] sm:$0xff]  ;;  %s2588_s15 = sshll.u32 %s274_s14, 4  ;;  %s4049_s15 = int_to_ptr.vmem [resolvable:$true] %s2588_s15 }
  0x1d   : > { %v2734_v44 = vld [vmem:[%s4093_s4 + $0xe0] sm:$0xff]  ;;  %v2749_v45 = vld [vmem:[%s4093_s4 + $0x118] sm:$0xff]  ;;  %v2736_v46 = vld [vmem:[%s4093_s4 + $0xf0] sm:$0xff]  ;;  %s2972_s16 = scalar_lea.vmem %s4049_s15, 32  ;;  %p2979_p0 = scmp.lt.s32.totalorder %s4049_s15, %s2977_s21 }
  0x1e   : > { %350 = vperm.xlu0 %2960, %v289_v8   ;;  %v2759_v47 = vld [vmem:[%s4093_s4 + $0x128] sm:$0xff]  ;;  %v2746_v48 = vld [vmem:[%s4093_s4 + $0x100] sm:$0xff]  ;;  %v2761_v49 = vld [vmem:[%s4093_s4 + $0x138] sm:$0xff]  ;;  %p2973_p11 = scmp.ne.s32.totalorder %s4049_s15, %s2972_s16  ;;  %p2980_p1 = scmp.lt.s32.totalorder %s2978_s22, %s2972_s16 }
  0x1f   : > { %2963 = vset.pattern.permute.xlu1 %v3036_v3  ;;  %v2748_v50 = vld [vmem:[%s4093_s4 + $0x110] sm:$0xff]  ;;  %v2771_v51 = vld [vmem:[%s4093_s4 + $0x148] sm:$0xff]  ;;  %v2758_v52 = vld [vmem:[%s4093_s4 + $0x120] sm:$0xff] }
  0x20   : > { %303 = vperm.xlu1 %2963, %v285_v9   ;;  %v2773_v53 = vld [vmem:[%s4093_s4 + $0x158] sm:$0xff]  ;;  %v2760_v54 = vld [vmem:[%s4093_s4 + $0x130] sm:$0xff]  ;;  %v2783_v56 = vld [vmem:[%s4093_s4 + $0x168] sm:$0xff]  ;;  %p2974_p12 = pnand %p2973_p11, %p3123_p5  ;;  %p2981_p2 = por %p2980_p1, %p2979_p0 }
  0x21   : > { %v2770_v57 = vld [vmem:[%s4093_s4 + $0x140] sm:$0xff]  ;;  %v2785_v59 = vld [vmem:[%s4093_s4 + $0x178] sm:$0xff]  ;;  %v2772_v62 = vld [vmem:[%s4093_s4 + $0x150] sm:$0xff] }
  0x22   : > { %2965 = vset.pattern.permute.xlu0 %v3037_v7  ;;  %v2795_v1 = vld [vmem:[%s4093_s4 + $0x188] sm:$0xff]  ;;  %v2797_v8 = vld [vmem:[%s4093_s4 + $0x198] sm:$0xff]  ;;  %p2975_p13 = pneg %p2974_p12 }
  0x23   : > { %367 = vperm.xlu0 %2965, %v283_v2  }
  0x24   : > { %2964 = vset.pattern.permute.xlu1 %v3038_v10  ;;  %p2982_p3 = pnand %p2981_p2, %p2975_p13 }
  0x25   : > { %417 = vperm.xlu1 %2964, %v283_v2   ;;  %v282_v2 = vld [vmem:[%s279_s20] sm:$0x77]  ;;  %s2574_s20 = scalar_lea.sflag [#allocation4], %s272_s30 }
  0x27   : > { %375 = vperm.xlu0 %2965, %v285_v9  }
  0x29   : > { %421 = vperm.xlu1 %2964, %v284_v5   ;;  %v2782_v5 = vld [vmem:[%s4093_s4 + $0x160] sm:$0xff] }
  0x2b   : > { %2969 = vset.pattern.permute.xlu0 %v3038_v10 }
  0x2c   : > { %429 = vperm.xlu0 %2969, %v286_v6  }
  0x2d   : > { %2966 = vset.pattern.permute.xlu1 %v3036_v3 }
  0x2e   : > { %355 = vperm.xlu1 %2966, %v290_v11  }
  0x30   : > { %2971 = vset.pattern.permute.xlu0 %v3036_v3 }
  0x31   : > { %494 = vperm.xlu0 %2971, %v480_v12   ;;  %v434_v12 = vsub.s32 2, %v3293_v58 }
  0x32   : > { %2967 = vset.pattern.permute.xlu1 %v3037_v7  ;;  %v319_v7 = vrot.slane %v282_v2, %v318_v0 }
  0x33   : > { %379 = vperm.xlu1 %2967, %v286_v6   ;;  %v315_v6 = vrot.slane %v282_v2, %v3305_v63 }
  0x35   : > { %645 = vperm.xlu0 %2971, %v2663_v14  }
  0x37   : > { %2968 = vset.pattern.permute.xlu1 %v3038_v10  ;;  %v388_v10 = vsub.s32 5, %v3293_v58 }
  0x38   : > { %425 = vperm.xlu1 %2968, %v285_v9   ;;  %v384_v9 = vsub.s32 1, %v3293_v58 }
  0x39   : > { %655 = vperm.xlu0 %2971, %v2665_v16   ;;  %v3328_v16 = vrot.slane %v315_v6, %v3305_v63 }
  0x3c   : > { %2970 = vset.pattern.permute.xlu1 %v3036_v3 }
  0x3d   : > { %484 = vperm.xlu1 %2970, %v478_v13   ;;  %800 = vperm.xlu0 %2971, %v2675_v19   ;;  %v438_v13 = vsub.s32 6, %v3293_v58  ;;  %v2489_v19 = vld [vmem:[%s4094_s5 + $0x8] sm:$0xff] }
  0x41   : > { %489 = vperm.xlu1 %2970, %v479_v15   ;;  %810 = vperm.xlu0 %2971, %v2677_v21   ;;  %v2784_v15 = vld [vmem:[%s4093_s4 + $0x170] sm:$0xff]  ;;  %v389_v21 = vrot.slane %v282_v2, %v388_v10  ;;  %v2538_v10 = vld [vmem:[#allocation2] sm:$0x1] }
  0x45   : > { %499 = vperm.xlu1 %2970, %v481_v17   ;;  %955 = vperm.xlu0 %2971, %v2687_v23   ;;  %v3331_v17 = vrot.slane %v319_v7, %v3305_v63  ;;  %v435_v23 = vrot.slane %v282_v2, %v434_v12 }
  0x49   : > { %640 = vperm.xlu1 %2970, %v2662_v20   ;;  %965 = vperm.xlu0 %2971, %v2689_v25   ;;  %v385_v20 = vrot.slane %v282_v2, %v384_v9  ;;  %v2794_v25 = vld [vmem:[%s4093_s4 + $0x180] sm:$0xff] }
  0x4d   : > { %650 = vperm.xlu1 %2970, %v2664_v22   ;;  %1110 = vperm.xlu0 %2971, %v2699_v27  }
  0x51   : > { %795 = vperm.xlu1 %2970, %v2674_v24   ;;  %1120 = vperm.xlu0 %2971, %v2701_v29   ;;  %v439_v24 = vrot.slane %v282_v2, %v438_v13  ;;  %v2491_v29 = vld [vmem:[%s4094_s5 + $0x18] sm:$0xff] }
  0x55   : > { %805 = vperm.xlu1 %2970, %v2676_v26   ;;  %1265 = vperm.xlu0 %2971, %v2711_v31   ;;  %v399_v31 = vrot.slane %v389_v21, %v384_v9 }
  0x59   : > { %950 = vperm.xlu1 %2970, %v2686_v28   ;;  %1275 = vperm.xlu0 %2971, %v2713_v33   ;;  %v3348_v33 = vrot.slane %v439_v24, %v434_v12 }
  0x5d   : > { %960 = vperm.xlu1 %2970, %v2688_v30   ;;  %1420 = vperm.xlu0 %2971, %v2723_v35   ;;  %v395_v30 = vrot.slane %v385_v20, %v384_v9 }
  0x61   : > { %1105 = vperm.xlu1 %2970, %v2698_v32   ;;  %1430 = vperm.xlu0 %2971, %v2725_v37   ;;  %v3346_v32 = vrot.slane %v435_v23, %v434_v12  ;;  %v2796_v37 = vld [vmem:[%s4093_s4 + $0x190] sm:$0xff] }
  0x65   : > { %1115 = vperm.xlu1 %2970, %v2700_v34   ;;  %1575 = vperm.xlu0 %2971, %v2735_v39  }
  0x69   : > { %1260 = vperm.xlu1 %2970, %v2710_v36   ;;  %1585 = vperm.xlu0 %2971, %v2737_v41  }
  0x6d   : > { %1270 = vperm.xlu1 %2970, %v2712_v38   ;;  %1730 = vperm.xlu0 %2971, %v2747_v43  }
  0x71   : > { %1415 = vperm.xlu1 %2970, %v2722_v40   ;;  %1740 = vperm.xlu0 %2971, %v2749_v45  }
  0x75   : > { %1425 = vperm.xlu1 %2970, %v2724_v42   ;;  %1885 = vperm.xlu0 %2971, %v2759_v47  }
  0x79   : > { %1570 = vperm.xlu1 %2970, %v2734_v44   ;;  %1895 = vperm.xlu0 %2971, %v2761_v49  }
  0x7d   : > { %1580 = vperm.xlu1 %2970, %v2736_v46   ;;  %2040 = vperm.xlu0 %2971, %v2771_v51   ;;  %v2488_v51 = vld [vmem:[%s4094_s5] sm:$0xff] }
  0x81   : > { %1725 = vperm.xlu1 %2970, %v2746_v48   ;;  %2050 = vperm.xlu0 %2971, %v2773_v53  }
  0x85   : > { %1735 = vperm.xlu1 %2970, %v2748_v50   ;;  %2195 = vperm.xlu0 %2971, %v2783_v56  }
  0x89   : > { %1880 = vperm.xlu1 %2970, %v2758_v52   ;;  %2205 = vperm.xlu0 %2971, %v2785_v59  }
  0x8d   : > { %1890 = vperm.xlu1 %2970, %v2760_v54   ;;  %2350 = vperm.xlu0 %2971, %v2795_v1  }
  0x91   : > { %v341_v60 = vpop.permute.xlu1 %340  ;;  %v294_v61 = vpop.permute.xlu0 %293  ;;  %2035 = vperm.xlu1 %2970, %v2770_v57   ;;  %2360 = vperm.xlu0 %2971, %v2797_v8  }
  0x92   : > { %v330_v26 = vmul.f32 %v3328_v16, %v294_v61  ;;  %v331_v27 = vmul.f32 %v3331_v17, %v294_v61  ;;  %v2490_v61 = vld [vmem:[%s4094_s5 + $0x10] sm:$0xff] }
  0x94   : > { %v358_v38 = vadd.f32 %v341_v60, %v330_v26  ;;  %v359_v39 = vadd.f32 %v341_v60, %v331_v27 }
  0x95   : > { %v346_v3 = vpop.permute.xlu1 %345  ;;  %v299_v4 = vpop.permute.xlu0 %298  ;;  %2045 = vperm.xlu1 %2970, %v2772_v62   ;;  %2499 = vperm.xlu0 %2971, %v2489_v19  }
  0x96   : > { %v332_v34 = vmul.f32 %v3328_v16, %v299_v4  ;;  %v333_v35 = vmul.f32 %v3331_v17, %v299_v4 }
  0x98   : > { %v360_v49 = vadd.f32 %v346_v3, %v332_v34  ;;  %v361_v50 = vadd.f32 %v346_v3, %v333_v35 }
  0x99   : > { %v3320_v11 = vpop.permute.xlu0 %308  ;;  %2190 = vperm.xlu1 %2970, %v2782_v5   ;;  %2509 = vperm.xlu0 %2971, %v2491_v29  }
  0x9a   : > { %v372_v14 = vpop.permute.xlu1 %371  ;;  %v336_v9 = vmul.f32 %v3328_v16, %v3320_v11  ;;  %v337_v12 = vmul.f32 %v3331_v17, %v3320_v11 }
  0x9b   : > { %v402_v42 = vmul.f32 %v395_v30, %v372_v14  ;;  %v403_v43 = vmul.f32 %v399_v31, %v372_v14 }
  0x9d   : > { %v3336_v22 = vpop.permute.xlu0 %350  ;;  %2200 = vperm.xlu1 %2970, %v2784_v15   ;;  %v410_v52 = vadd.f32 %v402_v42, %v360_v49  ;;  %v411_v53 = vadd.f32 %v403_v43, %v361_v50 }
  0x9f   : > { %v304_v28 = vpop.permute.xlu1 %303 }
  0xa0   : > { %v334_v13 = vmul.f32 %v3328_v16, %v304_v28  ;;  %v335_v14 = vmul.f32 %v3331_v17, %v304_v28 }
  0xa1   : > { %2345 = vperm.xlu1 %2970, %v2794_v25  }
  0xa2   : > { %v368_v36 = vpop.permute.xlu0 %367  ;;  %v362_v16 = vadd.f32 %v3336_v22, %v334_v13  ;;  %v363_v17 = vadd.f32 %v3336_v22, %v335_v14 }
  0xa3   : > { %v400_v40 = vmul.f32 %v395_v30, %v368_v36  ;;  %v401_v41 = vmul.f32 %v399_v31, %v368_v36 }
  0xa4   : > { %v418_v44 = vpop.permute.xlu1 %417 }
  0xa5   : > { %v408_v45 = vadd.f32 %v400_v40, %v358_v38  ;;  %v409_v46 = vadd.f32 %v401_v41, %v359_v39  ;;  %v450_v47 = vmul.f32 %v3346_v32, %v418_v44  ;;  %v451_v48 = vmul.f32 %v3348_v33, %v418_v44  ;;  %2355 = vperm.xlu1 %2970, %v2796_v37  }
  0xa6   : > { %v376_v1 = vpop.permute.xlu0 %375 }
  0xa7   : > { %v3360_v56 = vadd.f32 %v450_v47, %v408_v45  ;;  %v3362_v57 = vadd.f32 %v451_v48, %v409_v46  ;;  %v404_v19 = vmul.f32 %v395_v30, %v376_v1  ;;  %v405_v20 = vmul.f32 %v399_v31, %v376_v1  ;;  %v476_v45 = vld [vmem:[%s4092_s3 + $0x10] sm:$0xff]  ;;  %v475_v46 = vld [vmem:[%s4092_s3 + $0x8] sm:$0xff]  ;;  %v477_v47 = vld [vmem:[%s4092_s3 + $0x18] sm:$0xff] }
  0xa8   : > { %v422_v54 = vpop.permute.xlu1 %421 }
  0xa9   : > { %v452_v59 = vmul.f32 %v3346_v32, %v422_v54  ;;  %v453_v60 = vmul.f32 %v3348_v33, %v422_v54  ;;  %2494 = vperm.xlu1 %2970, %v2488_v51   ;;  %v467_v3 = vmax.f32 %v3362_v57, 0.0  ;;  %v466_v5 = vmax.f32 %v3360_v56, 0.0 }
  0xaa   : > { %v412_v34 = vadd.f32 %v404_v19, %v362_v16  ;;  %v413_v35 = vadd.f32 %v405_v20, %v363_v17 }
  0xab   : > { %v3369_v62 = vadd.f32 %v452_v59, %v410_v52  ;;  %v3371_v0 = vadd.f32 %v453_v60, %v411_v53  ;;  %v430_v15 = vpop.permute.xlu0 %429 }
  0xac   : > { %v456_v27 = vmul.f32 %v3346_v32, %v430_v15  ;;  %v457_v11 = vmul.f32 %v3348_v33, %v430_v15 }
  0xad   : > { %v356_v2 = vpop.permute.xlu1 %355  ;;  %v469_v4 = vmax.f32 %v3371_v0, 0.0  ;;  %v468_v6 = vmax.f32 %v3369_v62, 0.0  ;;  %2504 = vperm.xlu1 %2970, %v2490_v61  }
  0xae   : > { %v364_v23 = vadd.f32 %v356_v2, %v336_v9  ;;  %v365_v24 = vadd.f32 %v356_v2, %v337_v12 }
  0xaf   : > { %v2808_v7 = vpack.c.bf16 %v469_v4, %v467_v3  ;;  %v2810_v8 = vpack.c.bf16 %v468_v6, %v466_v5 }
  0xb0   : > { %v495_v50 = vpop.permute.xlu0 %494 }
  0xb1   : > { %2809 = vmatprep.subr.bf16.mxu0 %v2808_v7  ;;  %2912 = vmatprep.subr.bf16.mxu1 %v2808_v7 }
  0xb2   : > { %v380_v21 = vpop.permute.xlu1 %379  ;;  %2811 = vmatpush1.bf16.msra.mxu0 %v2810_v8  ;;  %2914 = vmatpush1.bf16.msra.mxu1 %v2810_v8 }
  0xb3   : > { %v406_v25 = vmul.f32 %v395_v30, %v380_v21  ;;  %v407_v26 = vmul.f32 %v399_v31, %v380_v21  ;;  %2541 = vperm.xlu1 %2970, %v2538_v10  }
  0xb5   : > { %v414_v28 = vadd.f32 %v406_v25, %v364_v23  ;;  %v415_v29 = vadd.f32 %v407_v26, %v365_v24 }
  0xb7   : > { %v426_v36 = vpop.permute.xlu1 %425  ;;  %v3395_v37 = vadd.f32 %v456_v27, %v414_v28  ;;  %v3397_v38 = vadd.f32 %v457_v11, %v415_v29 }
  0xb8   : > { %v454_v30 = vmul.f32 %v3346_v32, %v426_v36  ;;  %v455_v31 = vmul.f32 %v3348_v33, %v426_v36  ;;  %v474_v33 = vld [vmem:[%s4092_s3] sm:$0xff] }
  0xb9   : > { %v472_v41 = vmax.f32 %v3395_v37, 0.0  ;;  %v473_v22 = vmax.f32 %v3397_v38, 0.0 }
  0xba   : > { %v3401_v39 = vadd.f32 %v454_v30, %v412_v34  ;;  %v3403_v40 = vadd.f32 %v455_v31, %v413_v35 }
  0xbc   : > { %v470_v42 = vmax.f32 %v3401_v39, 0.0  ;;  %v471_v43 = vmax.f32 %v3403_v40, 0.0  ;;  %v485_v48 = vpop.permute.xlu1 %484 }
  0xbe   : > { %v2812_v44 = vpack.c.bf16 %v473_v22, %v471_v43  ;;  %v2814_v32 = vpack.c.bf16 %v472_v41, %v470_v42 }
  0xc0   : > { %2813 = vmatprep.subr.bf16.mxu0 %v2812_v44  ;;  %2913 = vmatprep.subr.bf16.mxu1 %v2812_v44  ;;  %v490_v49 = vpop.permute.xlu1 %489 }
  0xc1   : > { %2815 = vmatpush1.bf16.msra.mxu0 %v2814_v32  ;;  %2915 = vmatpush1.bf16.msra.mxu1 %v2814_v32 }
  0xc4   : > { %2654 = vmatmul.mubr.msk.f32.vlgmr.msra.gmra.mrb[0].mxu0 %vm502_vm0, %v474_v33  ;;  %2656 = vmatmul.mubr.msk.f32.vlgmr.msra.gmra.mrb[0].mxu1 %vm502_vm0, %v476_v45  ;;  %v500_v1 = vpop.permute.xlu1 %499 }
  0xc5   : > { %585 = vmatprep.mubr.f32.mxu0 %v3039_v18  ;;  %597 = vmatprep.mubr.f32.mxu1 %v3039_v18 }
  0xc8   : > { %2655 = vmatmul.mubr.msk.f32.gmra.mrb[2].mxu0 %vm502_vm0, %v475_v46  ;;  %2657 = vmatmul.mubr.msk.f32.gmra.mrb[2].mxu1 %vm502_vm0, %v477_v47  ;;  %v641_v37 = vpop.permute.xlu1 %640 }
  0xc9   : > { %734 = vmatprep.mubr.f32.mxu1 %v3039_v18  ;;  %889 = vmatprep.mubr.f32.mxu0 %v3039_v18 }
 0x197   : > { %v581_v51 = vpop.f32.mrb[0].mxu0  ;;  %v593_v52 = vpop.f32.mrb[0].mxu1 }
 0x198   : > { %v582_v53 = vadd.f32 %v581_v51, %v485_v48  ;;  %v583_v54 = vpop.f32.mrb[1].mxu0  ;;  %v595_v59 = vpop.f32.mrb[1].mxu1  ;;  %v594_v10 = vadd.f32 %v593_v52, %v495_v50 }
 0x199   : > { %v584_v60 = vadd.f32 %v583_v54, %v485_v48  ;;  %v596_v61 = vadd.f32 %v595_v59, %v495_v50 }
 0x19a   : > { %v604_v9 = vmax.f32 %v582_v53, 0.0  ;;  %v608_v16 = vmax.f32 %v594_v10, 0.0  ;;  %v651_v53 = vpop.permute.xlu1 %650 }
 0x19b   : > { %v605_v2 = vmax.f32 %v584_v60, 0.0  ;;  %v587_v7 = vpop.f32.mrb[2].mxu0  ;;  %v599_v8 = vpop.f32.mrb[2].mxu1  ;;  %v609_v19 = vmax.f32 %v596_v61, 0.0 }
 0x19c   : > { %v588_v12 = vadd.f32 %v587_v7, %v490_v49  ;;  %v600_v13 = vadd.f32 %v599_v8, %v500_v1  ;;  %v589_v14 = vpop.f32.mrb[3].mxu0  ;;  %v601_v15 = vpop.f32.mrb[3].mxu1  ;;  %v612_v11 = vmul.f32 0.1, %v604_v9  ;;  %v616_v44 = vmul.f32 0.1, %v608_v16 }
 0x19d   : > { %v590_v20 = vadd.f32 %v589_v14, %v490_v49  ;;  %v602_v21 = vadd.f32 %v601_v15, %v500_v1  ;;  %v613_v25 = vmul.f32 0.1, %v605_v2  ;;  %v617_v28 = vmul.f32 0.1, %v609_v19 }
 0x19e   : > { %v606_v23 = vmax.f32 %v588_v12, 0.0  ;;  %v610_v24 = vmax.f32 %v600_v13, 0.0  ;;  %v620_v40 = vadd.f32 %v612_v11, %v466_v5  ;;  %v3453_v0 = vadd.f32 %v616_v44, %v470_v42  ;;  %v2660_v5 = vld [vmem:[%s4092_s3 + $0x30] sm:$0xff] }
 0x19f   : > { %v607_v26 = vmax.f32 %v590_v20, 0.0  ;;  %v611_v27 = vmax.f32 %v602_v21, 0.0  ;;  %v621_v38 = vadd.f32 %v613_v25, %v467_v3  ;;  %v3443_v32 = vadd.f32 %v617_v28, %v471_v43  ;;  %v2658_v3 = vld [vmem:[%s4092_s3 + $0x20] sm:$0xff]  ;;  %v646_v43 = vpop.permute.xlu0 %645 }
 0x1a0   : > { %v614_v17 = vmul.f32 0.1, %v606_v23  ;;  %v618_v36 = vmul.f32 0.1, %v610_v24 }
 0x1a1   : > { %v615_v29 = vmul.f32 0.1, %v607_v26  ;;  %v619_v34 = vmul.f32 0.1, %v611_v27 }
 0x1a2   : > { %v622_v35 = vadd.f32 %v614_v17, %v468_v6  ;;  %v3447_v62 = vadd.f32 %v618_v36, %v472_v41  ;;  %v2661_v6 = vld [vmem:[%s4092_s3 + $0x38] sm:$0xff] }
 0x1a3   : > { %v623_v30 = vadd.f32 %v615_v29, %v469_v4  ;;  %v3439_v31 = vadd.f32 %v619_v34, %v473_v22  ;;  %v2659_v4 = vld [vmem:[%s4092_s3 + $0x28] sm:$0xff]  ;;  %v656_v12 = vpop.permute.xlu0 %655 }
 0x1a4   : > { %v2818_v45 = vpack.c.bf16 %v622_v35, %v620_v40  ;;  %v2822_v56 = vpack.c.bf16 %v3447_v62, %v3453_v0 }
 0x1a5   : > { %v2816_v33 = vpack.c.bf16 %v623_v30, %v621_v38  ;;  %v2820_v57 = vpack.c.bf16 %v3439_v31, %v3443_v32 }
 0x1a7   : > { %2817 = vmatprep.subr.bf16.mxu1 %v2816_v33  ;;  %v2670_v33 = vld [vmem:[%s4092_s3 + $0x40] sm:$0xff] }
 0x1a8   : > { %2819 = vmatpush1.bf16.msra.mxu1 %v2818_v45  ;;  %v2673_v45 = vld [vmem:[%s4092_s3 + $0x58] sm:$0xff] }
 0x1a9   : > { %2821 = vmatprep.subr.bf16.mxu1 %v2820_v57 }
 0x1ac   : > { %2823 = vmatpush1.bf16.msra.mxu1 %v2822_v56 }
 0x1af   : > { %2666 = vmatmul.mubr.msk.f32.vlgmr.msra.gmra.mrb[4].mxu1 %vm502_vm0, %v2658_v3 }
 0x1b0   : > { %740 = vmatprep.mubr.f32.mxu1 %v3039_v18 }
 0x1b3   : > { %2667 = vmatmul.mubr.msk.f32.gmra.mrb[6].mxu1 %vm502_vm0, %v2659_v4  ;;  %v801_v4 = vpop.permute.xlu0 %800 }
 0x1b4   : > { %746 = vmatprep.mubr.f32.mxu1 %v3039_v18 }
 0x1b7   : > { %2668 = vmatmul.mubr.msk.f32.gmra.mrb[8].mxu1 %vm502_vm0, %v2660_v5 }
 0x1b8   : > { %752 = vmatprep.mubr.f32.mxu1 %v3039_v18 }
 0x1bb   : > { %2669 = vmatmul.mubr.msk.f32.gmra.mrb[10].mxu1 %vm502_vm0, %v2661_v6 }
 0x1bc   : > { %1044 = vmatprep.mubr.f32.mxu1 %v3039_v18 }
 0x282   : > { %v736_v39 = vpop.f32.mrb[4].mxu1 }
 0x283   : > { %v737_v41 = vadd.f32 %v736_v39, %v641_v37  ;;  %v738_v22 = vpop.f32.mrb[5].mxu1 }
 0x284   : > { %v739_v42 = vadd.f32 %v738_v22, %v641_v37 }
 0x285   : > { %v759_v48 = vmax.f32 %v737_v41, 0.0 }
 0x286   : > { %v760_v46 = vmax.f32 %v739_v42, 0.0  ;;  %v742_v47 = vpop.f32.mrb[6].mxu1 }
 0x287   : > { %v743_v49 = vadd.f32 %v742_v47, %v646_v43  ;;  %v744_v50 = vpop.f32.mrb[7].mxu1  ;;  %v767_v61 = vmul.f32 0.1, %v759_v48 }
 0x288   : > { %v745_v51 = vadd.f32 %v744_v50, %v646_v43  ;;  %v768_v54 = vmul.f32 0.1, %v760_v46 }
 0x289   : > { %v761_v52 = vmax.f32 %v743_v49, 0.0  ;;  %v3483_v20 = vadd.f32 %v767_v61, %v620_v40 }
 0x28a   : > { %v762_v59 = vmax.f32 %v745_v51, 0.0  ;;  %v748_v60 = vpop.f32.mrb[8].mxu1  ;;  %v3479_v13 = vadd.f32 %v768_v54, %v621_v38 }
 0x28b   : > { %v769_v1 = vmul.f32 0.1, %v761_v52  ;;  %v749_v2 = vadd.f32 %v748_v60, %v651_v53  ;;  %v750_v7 = vpop.f32.mrb[9].mxu1  ;;  %v811_v60 = vpop.permute.xlu0 %810 }
 0x28c   : > { %v770_v8 = vmul.f32 0.1, %v762_v59  ;;  %v751_v9 = vadd.f32 %v750_v7, %v651_v53 }
 0x28d   : > { %v3477_v10 = vadd.f32 %v769_v1, %v622_v35  ;;  %v763_v21 = vmax.f32 %v749_v2, 0.0 }
 0x28e   : > { %v3481_v14 = vadd.f32 %v770_v8, %v623_v30  ;;  %v764_v15 = vmax.f32 %v751_v9, 0.0  ;;  %v754_v19 = vpop.f32.mrb[10].mxu1 }
 0x28f   : > { %v755_v23 = vadd.f32 %v754_v19, %v656_v12  ;;  %v756_v24 = vpop.f32.mrb[11].mxu1  ;;  %v2826_v27 = vpack.c.bf16 %v3477_v10, %v3483_v20  ;;  %v771_v28 = vmul.f32 0.1, %v763_v21 }
 0x290   : > { %v757_v25 = vadd.f32 %v756_v24, %v656_v12  ;;  %v2824_v26 = vpack.c.bf16 %v3481_v14, %v3479_v13  ;;  %v772_v16 = vmul.f32 0.1, %v764_v15 }
 0x291   : > { %v765_v11 = vmax.f32 %v755_v23, 0.0  ;;  %v3499_v30 = vadd.f32 %v771_v28, %v3453_v0 }
 0x292   : > { %v766_v17 = vmax.f32 %v757_v25, 0.0  ;;  %2825 = vmatprep.subr.bf16.mxu0 %v2824_v26  ;;  %v3493_v36 = vadd.f32 %v772_v16, %v3443_v32  ;;  %v2672_v32 = vld [vmem:[%s4092_s3 + $0x50] sm:$0xff] }
 0x293   : > { %v773_v29 = vmul.f32 0.1, %v765_v11  ;;  %2827 = vmatpush1.bf16.msra.mxu0 %v2826_v27 }
 0x294   : > { %v774_v34 = vmul.f32 0.1, %v766_v17 }
 0x295   : > { %v3490_v35 = vadd.f32 %v773_v29, %v3447_v62  ;;  %v796_v62 = vpop.permute.xlu1 %795  ;;  %v2682_v29 = vld [vmem:[%s4092_s3 + $0x60] sm:$0xff] }
 0x296   : > { %v3496_v38 = vadd.f32 %v774_v34, %v3439_v31  ;;  %v2671_v31 = vld [vmem:[%s4092_s3 + $0x48] sm:$0xff] }
 0x297   : > { %v2830_v44 = vpack.c.bf16 %v3490_v35, %v3499_v30  ;;  %v2683_v34 = vld [vmem:[%s4092_s3 + $0x68] sm:$0xff] }
 0x298   : > { %v2828_v40 = vpack.c.bf16 %v3496_v38, %v3493_v36 }
 0x299   : > { %v806_v43 = vpop.permute.xlu1 %805 }
 0x29a   : > { %2829 = vmatprep.subr.bf16.mxu0 %v2828_v40 }
 0x29b   : > { %2831 = vmatpush1.bf16.msra.mxu0 %v2830_v44 }
 0x29e   : > { %2678 = vmatmul.mubr.msk.f32.vlgmr.msra.gmra.mrb[4].mxu0 %vm502_vm0, %v2670_v33 }
 0x29f   : > { %895 = vmatprep.mubr.f32.mxu0 %v3039_v18 }
 0x2a2   : > { %2679 = vmatmul.mubr.msk.f32.gmra.mrb[6].mxu0 %vm502_vm0, %v2671_v31  ;;  %v956_v31 = vpop.permute.xlu0 %955 }
 0x2a3   : > { %901 = vmatprep.mubr.f32.mxu0 %v3039_v18 }
 0x2a6   : > { %2680 = vmatmul.mubr.msk.f32.gmra.mrb[8].mxu0 %vm502_vm0, %v2672_v32 }
 0x2a7   : > { %907 = vmatprep.mubr.f32.mxu0 %v3039_v18 }
 0x2aa   : > { %2681 = vmatmul.mubr.msk.f32.gmra.mrb[10].mxu0 %vm502_vm0, %v2673_v45 }
 0x2ab   : > { %1199 = vmatprep.mubr.f32.mxu0 %v3039_v18 }
 0x371   : > { %v891_v57 = vpop.f32.mrb[4].mxu0 }
 0x372   : > { %v892_v0 = vadd.f32 %v891_v57, %v796_v62  ;;  %v893_v56 = vpop.f32.mrb[5].mxu0 }
 0x373   : > { %v894_v3 = vadd.f32 %v893_v56, %v796_v62 }
 0x374   : > { %v914_v37 = vmax.f32 %v892_v0, 0.0 }
 0x375   : > { %v915_v5 = vmax.f32 %v894_v3, 0.0  ;;  %v897_v6 = vpop.f32.mrb[6].mxu0 }
 0x376   : > { %v898_v39 = vadd.f32 %v897_v6, %v801_v4  ;;  %v899_v41 = vpop.f32.mrb[7].mxu0  ;;  %v922_v49 = vmul.f32 0.1, %v914_v37 }
 0x377   : > { %v900_v22 = vadd.f32 %v899_v41, %v801_v4  ;;  %v923_v46 = vmul.f32 0.1, %v915_v5 }
 0x378   : > { %v916_v42 = vmax.f32 %v898_v39, 0.0  ;;  %v3535_v8 = vadd.f32 %v922_v49, %v3483_v20 }
 0x379   : > { %v917_v47 = vmax.f32 %v900_v22, 0.0  ;;  %v903_v48 = vpop.f32.mrb[8].mxu0  ;;  %v3529_v61 = vadd.f32 %v923_v46, %v3479_v13 }
 0x37a   : > { %v924_v50 = vmul.f32 0.1, %v916_v42  ;;  %v904_v51 = vadd.f32 %v903_v48, %v806_v43  ;;  %v905_v52 = vpop.f32.mrb[9].mxu0  ;;  %v966_v48 = vpop.permute.xlu0 %965 }
 0x37b   : > { %v925_v53 = vmul.f32 0.1, %v917_v47  ;;  %v906_v54 = vadd.f32 %v905_v52, %v806_v43 }
 0x37c   : > { %v3526_v59 = vadd.f32 %v924_v50, %v3477_v10  ;;  %v918_v9 = vmax.f32 %v904_v51, 0.0 }
 0x37d   : > { %v3532_v1 = vadd.f32 %v925_v53, %v3481_v14  ;;  %v919_v2 = vmax.f32 %v906_v54, 0.0  ;;  %v909_v7 = vpop.f32.mrb[10].mxu0 }
 0x37e   : > { %v910_v12 = vadd.f32 %v909_v7, %v811_v60  ;;  %v911_v15 = vpop.f32.mrb[11].mxu0  ;;  %v2834_v21 = vpack.c.bf16 %v3526_v59, %v3535_v8  ;;  %v926_v14 = vmul.f32 0.1, %v918_v9 }
 0x37f   : > { %v912_v19 = vadd.f32 %v911_v15, %v811_v60  ;;  %v2832_v10 = vpack.c.bf16 %v3532_v1, %v3529_v61  ;;  %v927_v23 = vmul.f32 0.1, %v919_v2 }
 0x380   : > { %v920_v13 = vmax.f32 %v910_v12, 0.0  ;;  %v3551_v16 = vadd.f32 %v926_v14, %v3499_v30 }
 0x381   : > { %v921_v24 = vmax.f32 %v912_v19, 0.0  ;;  %2833 = vmatprep.subr.bf16.mxu1 %v2832_v10  ;;  %v3545_v27 = vadd.f32 %v927_v23, %v3493_v36  ;;  %v2685_v36 = vld [vmem:[%s4092_s3 + $0x78] sm:$0xff] }
 0x382   : > { %v928_v25 = vmul.f32 0.1, %v920_v13  ;;  %2835 = vmatpush1.bf16.msra.mxu1 %v2834_v21 }
 0x383   : > { %v929_v26 = vmul.f32 0.1, %v921_v24 }
 0x384   : > { %v3542_v20 = vadd.f32 %v928_v25, %v3490_v35  ;;  %v2684_v35 = vld [vmem:[%s4092_s3 + $0x70] sm:$0xff]  ;;  %v2694_v25 = vld [vmem:[%s4092_s3 + $0x80] sm:$0xff] }
 0x385   : > { %v3548_v11 = vadd.f32 %v929_v26, %v3496_v38  ;;  %v951_v38 = vpop.permute.xlu1 %950  ;;  %v2695_v26 = vld [vmem:[%s4092_s3 + $0x88] sm:$0xff] }
 0x386   : > { %v2838_v28 = vpack.c.bf16 %v3542_v20, %v3551_v16 }
 0x387   : > { %v2836_v17 = vpack.c.bf16 %v3548_v11, %v3545_v27 }
 0x389   : > { %2837 = vmatprep.subr.bf16.mxu1 %v2836_v17  ;;  %v961_v4 = vpop.permute.xlu1 %960 }
 0x38a   : > { %2839 = vmatpush1.bf16.msra.mxu1 %v2838_v28 }
 0x38d   : > { %2690 = vmatmul.mubr.msk.f32.vlgmr.msra.gmra.mrb[12].mxu1 %vm502_vm0, %v2682_v29 }
 0x38e   : > { %1050 = vmatprep.mubr.f32.mxu1 %v3039_v18 }
 0x391   : > { %2691 = vmatmul.mubr.msk.f32.gmra.mrb[14].mxu1 %vm502_vm0, %v2683_v34  ;;  %v1111_v34 = vpop.permute.xlu0 %1110 }
 0x392   : > { %1056 = vmatprep.mubr.f32.mxu1 %v3039_v18 }
 0x395   : > { %2692 = vmatmul.mubr.msk.f32.gmra.mrb[16].mxu1 %vm502_vm0, %v2684_v35 }
 0x396   : > { %1062 = vmatprep.mubr.f32.mxu1 %v3039_v18 }
 0x399   : > { %2693 = vmatmul.mubr.msk.f32.gmra.mrb[18].mxu1 %vm502_vm0, %v2685_v36 }
 0x39a   : > { %1354 = vmatprep.mubr.f32.mxu1 %v3039_v18 }
 0x460   : > { %v1046_v30 = vpop.f32.mrb[12].mxu1 }
 0x461   : > { %v1047_v40 = vadd.f32 %v1046_v30, %v951_v38  ;;  %v1048_v44 = vpop.f32.mrb[13].mxu1 }
 0x462   : > { %v1049_v33 = vadd.f32 %v1048_v44, %v951_v38 }
 0x463   : > { %v1069_v62 = vmax.f32 %v1047_v40, 0.0 }
 0x464   : > { %v1070_v32 = vmax.f32 %v1049_v33, 0.0  ;;  %v1052_v45 = vpop.f32.mrb[14].mxu1 }
 0x465   : > { %v1053_v57 = vadd.f32 %v1052_v45, %v956_v31  ;;  %v1054_v0 = vpop.f32.mrb[15].mxu1  ;;  %v1077_v39 = vmul.f32 0.1, %v1069_v62 }
 0x466   : > { %v1055_v56 = vadd.f32 %v1054_v0, %v956_v31  ;;  %v1078_v5 = vmul.f32 0.1, %v1070_v32 }
 0x467   : > { %v1071_v3 = vmax.f32 %v1053_v57, 0.0  ;;  %v3587_v53 = vadd.f32 %v1077_v39, %v3535_v8 }
 0x468   : > { %v1072_v6 = vmax.f32 %v1055_v56, 0.0  ;;  %v1058_v37 = vpop.f32.mrb[16].mxu1  ;;  %v3581_v49 = vadd.f32 %v1078_v5, %v3529_v61 }
 0x469   : > { %v1079_v41 = vmul.f32 0.1, %v1071_v3  ;;  %v1059_v22 = vadd.f32 %v1058_v37, %v961_v4  ;;  %v1060_v42 = vpop.f32.mrb[17].mxu1  ;;  %v1121_v37 = vpop.permute.xlu0 %1120 }
 0x46a   : > { %v1080_v43 = vmul.f32 0.1, %v1072_v6  ;;  %v1061_v46 = vadd.f32 %v1060_v42, %v961_v4 }
 0x46b   : > { %v3578_v47 = vadd.f32 %v1079_v41, %v3526_v59  ;;  %v1073_v54 = vmax.f32 %v1059_v22, 0.0 }
 0x46c   : > { %v3584_v50 = vadd.f32 %v1080_v43, %v3532_v1  ;;  %v1074_v51 = vmax.f32 %v1061_v46, 0.0  ;;  %v1064_v52 = vpop.f32.mrb[18].mxu1 }
 0x46d   : > { %v1065_v60 = vadd.f32 %v1064_v52, %v966_v48  ;;  %v1066_v2 = vpop.f32.mrb[19].mxu1  ;;  %v2842_v9 = vpack.c.bf16 %v3578_v47, %v3587_v53  ;;  %v1081_v1 = vmul.f32 0.1, %v1073_v54 }
 0x46e   : > { %v1067_v7 = vadd.f32 %v1066_v2, %v966_v48  ;;  %v2840_v59 = vpack.c.bf16 %v3584_v50, %v3581_v49  ;;  %v1082_v12 = vmul.f32 0.1, %v1074_v51 }
 0x46f   : > { %v1075_v61 = vmax.f32 %v1065_v60, 0.0  ;;  %v3603_v23 = vadd.f32 %v1081_v1, %v3551_v16 }
 0x470   : > { %v1076_v15 = vmax.f32 %v1067_v7, 0.0  ;;  %2841 = vmatprep.subr.bf16.mxu0 %v2840_v59  ;;  %v3597_v21 = vadd.f32 %v1082_v12, %v3545_v27  ;;  %v2697_v27 = vld [vmem:[%s4092_s3 + $0x98] sm:$0xff] }
 0x471   : > { %v1083_v19 = vmul.f32 0.1, %v1075_v61  ;;  %2843 = vmatpush1.bf16.msra.mxu0 %v2842_v9 }
 0x472   : > { %v1084_v10 = vmul.f32 0.1, %v1076_v15 }
 0x473   : > { %v3594_v8 = vadd.f32 %v1083_v19, %v3542_v20  ;;  %v2696_v20 = vld [vmem:[%s4092_s3 + $0x90] sm:$0xff]  ;;  %v2706_v19 = vld [vmem:[%s4092_s3 + $0xa0] sm:$0xff] }
 0x474   : > { %v3600_v13 = vadd.f32 %v1084_v10, %v3548_v11  ;;  %v1106_v11 = vpop.permute.xlu1 %1105  ;;  %v2707_v10 = vld [vmem:[%s4092_s3 + $0xa8] sm:$0xff] }
 0x475   : > { %v2846_v14 = vpack.c.bf16 %v3594_v8, %v3603_v23 }
 0x476   : > { %v2844_v24 = vpack.c.bf16 %v3600_v13, %v3597_v21 }
 0x478   : > { %2845 = vmatprep.subr.bf16.mxu0 %v2844_v24  ;;  %v1116_v31 = vpop.permute.xlu1 %1115 }
 0x479   : > { %2847 = vmatpush1.bf16.msra.mxu0 %v2846_v14 }
 0x47c   : > { %2702 = vmatmul.mubr.msk.f32.vlgmr.msra.gmra.mrb[12].mxu0 %vm502_vm0, %v2694_v25 }
 0x47d   : > { %1205 = vmatprep.mubr.f32.mxu0 %v3039_v18 }
 0x480   : > { %2703 = vmatmul.mubr.msk.f32.gmra.mrb[14].mxu0 %vm502_vm0, %v2695_v26  ;;  %v1266_v26 = vpop.permute.xlu0 %1265 }
 0x481   : > { %1211 = vmatprep.mubr.f32.mxu0 %v3039_v18 }
 0x484   : > { %2704 = vmatmul.mubr.msk.f32.gmra.mrb[16].mxu0 %vm502_vm0, %v2696_v20 }
 0x485   : > { %1217 = vmatprep.mubr.f32.mxu0 %v3039_v18 }
 0x488   : > { %2705 = vmatmul.mubr.msk.f32.gmra.mrb[18].mxu0 %vm502_vm0, %v2697_v27 }
 0x489   : > { %1509 = vmatprep.mubr.f32.mxu0 %v3039_v18 }
 0x54f   : > { %v1201_v16 = vpop.f32.mrb[12].mxu0 }
 0x550   : > { %v1202_v17 = vadd.f32 %v1201_v16, %v1106_v11  ;;  %v1203_v28 = vpop.f32.mrb[13].mxu0 }
 0x551   : > { %v1204_v29 = vadd.f32 %v1203_v28, %v1106_v11 }
 0x552   : > { %v1224_v38 = vmax.f32 %v1202_v17, 0.0 }
 0x553   : > { %v1225_v35 = vmax.f32 %v1204_v29, 0.0  ;;  %v1207_v36 = vpop.f32.mrb[14].mxu0 }
 0x554   : > { %v1208_v30 = vadd.f32 %v1207_v36, %v1111_v34  ;;  %v1209_v40 = vpop.f32.mrb[15].mxu0  ;;  %v1232_v57 = vmul.f32 0.1, %v1224_v38 }
 0x555   : > { %v1210_v44 = vadd.f32 %v1209_v40, %v1111_v34  ;;  %v1233_v32 = vmul.f32 0.1, %v1225_v35 }
 0x556   : > { %v1226_v33 = vmax.f32 %v1208_v30, 0.0  ;;  %v3639_v43 = vadd.f32 %v1232_v57, %v3587_v53 }
 0x557   : > { %v1227_v45 = vmax.f32 %v1210_v44, 0.0  ;;  %v1213_v62 = vpop.f32.mrb[16].mxu0  ;;  %v3633_v39 = vadd.f32 %v1233_v32, %v3581_v49 }
 0x558   : > { %v1234_v0 = vmul.f32 0.1, %v1226_v33  ;;  %v1214_v56 = vadd.f32 %v1213_v62, %v1116_v31  ;;  %v1215_v3 = vpop.f32.mrb[17].mxu0  ;;  %v1276_v62 = vpop.permute.xlu0 %1275 }
 0x559   : > { %v1235_v4 = vmul.f32 0.1, %v1227_v45  ;;  %v1216_v5 = vadd.f32 %v1215_v3, %v1116_v31 }
 0x55a   : > { %v3630_v6 = vadd.f32 %v1234_v0, %v3578_v47  ;;  %v1228_v46 = vmax.f32 %v1214_v56, 0.0 }
 0x55b   : > { %v3636_v41 = vadd.f32 %v1235_v4, %v3584_v50  ;;  %v1229_v22 = vmax.f32 %v1216_v5, 0.0  ;;  %v1219_v42 = vpop.f32.mrb[18].mxu0 }
 0x55c   : > { %v1220_v48 = vadd.f32 %v1219_v42, %v1121_v37  ;;  %v1221_v51 = vpop.f32.mrb[19].mxu0  ;;  %v2850_v54 = vpack.c.bf16 %v3630_v6, %v3639_v43  ;;  %v1236_v50 = vmul.f32 0.1, %v1228_v46 }
 0x55d   : > { %v1222_v52 = vadd.f32 %v1221_v51, %v1121_v37  ;;  %v2848_v47 = vpack.c.bf16 %v3636_v41, %v3633_v39  ;;  %v1237_v60 = vmul.f32 0.1, %v1229_v22 }
 0x55e   : > { %v1230_v49 = vmax.f32 %v1220_v48, 0.0  ;;  %v3655_v12 = vadd.f32 %v1236_v50, %v3603_v23 }
 0x55f   : > { %v1231_v2 = vmax.f32 %v1222_v52, 0.0  ;;  %2849 = vmatprep.subr.bf16.mxu1 %v2848_v47  ;;  %v3649_v9 = vadd.f32 %v1237_v60, %v3597_v21  ;;  %v2709_v21 = vld [vmem:[%s4092_s3 + $0xb8] sm:$0xff] }
 0x560   : > { %v1238_v7 = vmul.f32 0.1, %v1230_v49  ;;  %2851 = vmatpush1.bf16.msra.mxu1 %v2850_v54 }
 0x561   : > { %v1239_v59 = vmul.f32 0.1, %v1231_v2 }
 0x562   : > { %v3646_v53 = vadd.f32 %v1238_v7, %v3594_v8  ;;  %v2708_v8 = vld [vmem:[%s4092_s3 + $0xb0] sm:$0xff]  ;;  %v2718_v7 = vld [vmem:[%s4092_s3 + $0xc0] sm:$0xff] }
 0x563   : > { %v3652_v61 = vadd.f32 %v1239_v59, %v3600_v13  ;;  %v1261_v13 = vpop.permute.xlu1 %1260  ;;  %v2719_v59 = vld [vmem:[%s4092_s3 + $0xc8] sm:$0xff] }
 0x564   : > { %v2854_v1 = vpack.c.bf16 %v3646_v53, %v3655_v12 }
 0x565   : > { %v2852_v15 = vpack.c.bf16 %v3652_v61, %v3649_v9 }
 0x567   : > { %2853 = vmatprep.subr.bf16.mxu1 %v2852_v15  ;;  %v1271_v34 = vpop.permute.xlu1 %1270 }
 0x568   : > { %2855 = vmatpush1.bf16.msra.mxu1 %v2854_v1 }
 0x56b   : > { %2714 = vmatmul.mubr.msk.f32.vlgmr.msra.gmra.mrb[20].mxu1 %vm502_vm0, %v2706_v19 }
 0x56c   : > { %1360 = vmatprep.mubr.f32.mxu1 %v3039_v18 }
 0x56f   : > { %2715 = vmatmul.mubr.msk.f32.gmra.mrb[22].mxu1 %vm502_vm0, %v2707_v10  ;;  %v1421_v10 = vpop.permute.xlu0 %1420 }
 0x570   : > { %1366 = vmatprep.mubr.f32.mxu1 %v3039_v18 }
 0x573   : > { %2716 = vmatmul.mubr.msk.f32.gmra.mrb[24].mxu1 %vm502_vm0, %v2708_v8 }
 0x574   : > { %1372 = vmatprep.mubr.f32.mxu1 %v3039_v18 }
 0x577   : > { %2717 = vmatmul.mubr.msk.f32.gmra.mrb[26].mxu1 %vm502_vm0, %v2709_v21 }
 0x578   : > { %1664 = vmatprep.mubr.f32.mxu1 %v3039_v18 }
 0x63e   : > { %v1356_v23 = vpop.f32.mrb[20].mxu1 }
 0x63f   : > { %v1357_v24 = vadd.f32 %v1356_v23, %v1261_v13  ;;  %v1358_v14 = vpop.f32.mrb[21].mxu1 }
 0x640   : > { %v1359_v25 = vadd.f32 %v1358_v14, %v1261_v13 }
 0x641   : > { %v1379_v11 = vmax.f32 %v1357_v24, 0.0 }
 0x642   : > { %v1380_v20 = vmax.f32 %v1359_v25, 0.0  ;;  %v1362_v27 = vpop.f32.mrb[22].mxu1 }
 0x643   : > { %v1363_v16 = vadd.f32 %v1362_v27, %v1266_v26  ;;  %v1364_v17 = vpop.f32.mrb[23].mxu1  ;;  %v1387_v30 = vmul.f32 0.1, %v1379_v11 }
 0x644   : > { %v1365_v28 = vadd.f32 %v1364_v17, %v1266_v26  ;;  %v1388_v35 = vmul.f32 0.1, %v1380_v20 }
 0x645   : > { %v1381_v29 = vmax.f32 %v1363_v16, 0.0  ;;  %v3691_v4 = vadd.f32 %v1387_v30, %v3639_v43 }
 0x646   : > { %v1382_v36 = vmax.f32 %v1365_v28, 0.0  ;;  %v1368_v38 = vpop.f32.mrb[24].mxu1  ;;  %v3685_v57 = vadd.f32 %v1388_v35, %v3633_v39 }
 0x647   : > { %v1389_v40 = vmul.f32 0.1, %v1381_v29  ;;  %v1369_v44 = vadd.f32 %v1368_v38, %v1271_v34  ;;  %v1370_v33 = vpop.f32.mrb[25].mxu1  ;;  %v1431_v38 = vpop.permute.xlu0 %1430 }
 0x648   : > { %v1390_v31 = vmul.f32 0.1, %v1382_v36  ;;  %v1371_v32 = vadd.f32 %v1370_v33, %v1271_v34 }
 0x649   : > { %v3682_v45 = vadd.f32 %v1389_v40, %v3630_v6  ;;  %v1383_v5 = vmax.f32 %v1369_v44, 0.0 }
 0x64a   : > { %v3688_v0 = vadd.f32 %v1390_v31, %v3636_v41  ;;  %v1384_v56 = vmax.f32 %v1371_v32, 0.0  ;;  %v1374_v3 = vpop.f32.mrb[26].mxu1 }
 0x64b   : > { %v1375_v37 = vadd.f32 %v1374_v3, %v1276_v62  ;;  %v1376_v22 = vpop.f32.mrb[27].mxu1  ;;  %v2858_v46 = vpack.c.bf16 %v3682_v45, %v3691_v4  ;;  %v1391_v41 = vmul.f32 0.1, %v1383_v5 }
 0x64c   : > { %v1377_v42 = vadd.f32 %v1376_v22, %v1276_v62  ;;  %v2856_v6 = vpack.c.bf16 %v3688_v0, %v3685_v57  ;;  %v1392_v48 = vmul.f32 0.1, %v1384_v56 }
 0x64d   : > { %v1385_v39 = vmax.f32 %v1375_v37, 0.0  ;;  %v3707_v60 = vadd.f32 %v1391_v41, %v3655_v12 }
 0x64e   : > { %v1386_v51 = vmax.f32 %v1377_v42, 0.0  ;;  %2857 = vmatprep.subr.bf16.mxu0 %v2856_v6  ;;  %v3701_v54 = vadd.f32 %v1392_v48, %v3649_v9  ;;  %v2721_v9 = vld [vmem:[%s4092_s3 + $0xd8] sm:$0xff] }
 0x64f   : > { %v1393_v52 = vmul.f32 0.1, %v1385_v39  ;;  %2859 = vmatpush1.bf16.msra.mxu0 %v2858_v46 }
 0x650   : > { %v1394_v47 = vmul.f32 0.1, %v1386_v51 }
 0x651   : > { %v3698_v43 = vadd.f32 %v1393_v52, %v3646_v53  ;;  %v2720_v53 = vld [vmem:[%s4092_s3 + $0xd0] sm:$0xff]  ;;  %v2730_v52 = vld [vmem:[%s4092_s3 + $0xe0] sm:$0xff] }
 0x652   : > { %v3704_v49 = vadd.f32 %v1394_v47, %v3652_v61  ;;  %v1416_v61 = vpop.permute.xlu1 %1415  ;;  %v2731_v47 = vld [vmem:[%s4092_s3 + $0xe8] sm:$0xff] }
 0x653   : > { %v2862_v50 = vpack.c.bf16 %v3698_v43, %v3707_v60 }
 0x654   : > { %v2860_v2 = vpack.c.bf16 %v3704_v49, %v3701_v54 }
 0x656   : > { %2861 = vmatprep.subr.bf16.mxu0 %v2860_v2  ;;  %v1426_v26 = vpop.permute.xlu1 %1425 }
 0x657   : > { %2863 = vmatpush1.bf16.msra.mxu0 %v2862_v50 }
 0x65a   : > { %2726 = vmatmul.mubr.msk.f32.vlgmr.msra.gmra.mrb[20].mxu0 %vm502_vm0, %v2718_v7 }
 0x65b   : > { %1515 = vmatprep.mubr.f32.mxu0 %v3039_v18 }
 0x65e   : > { %2727 = vmatmul.mubr.msk.f32.gmra.mrb[22].mxu0 %vm502_vm0, %v2719_v59  ;;  %v1576_v59 = vpop.permute.xlu0 %1575 }
 0x65f   : > { %1521 = vmatprep.mubr.f32.mxu0 %v3039_v18 }
 0x662   : > { %2728 = vmatmul.mubr.msk.f32.gmra.mrb[24].mxu0 %vm502_vm0, %v2720_v53 }
 0x663   : > { %1527 = vmatprep.mubr.f32.mxu0 %v3039_v18 }
 0x666   : > { %2729 = vmatmul.mubr.msk.f32.gmra.mrb[26].mxu0 %vm502_vm0, %v2721_v9 }
 0x667   : > { %1819 = vmatprep.mubr.f32.mxu0 %v3039_v18 }
 0x72d   : > { %v1511_v12 = vpop.f32.mrb[20].mxu0 }
 0x72e   : > { %v1512_v15 = vadd.f32 %v1511_v12, %v1416_v61  ;;  %v1513_v1 = vpop.f32.mrb[21].mxu0 }
 0x72f   : > { %v1514_v19 = vadd.f32 %v1513_v1, %v1416_v61 }
 0x730   : > { %v1534_v13 = vmax.f32 %v1512_v15, 0.0 }
 0x731   : > { %v1535_v8 = vmax.f32 %v1514_v19, 0.0  ;;  %v1517_v21 = vpop.f32.mrb[22].mxu0 }
 0x732   : > { %v1518_v23 = vadd.f32 %v1517_v21, %v1421_v10  ;;  %v1519_v24 = vpop.f32.mrb[23].mxu0  ;;  %v1542_v16 = vmul.f32 0.1, %v1534_v13 }
 0x733   : > { %v1520_v14 = vadd.f32 %v1519_v24, %v1421_v10  ;;  %v1543_v20 = vmul.f32 0.1, %v1535_v8 }
 0x734   : > { %v1536_v25 = vmax.f32 %v1518_v23, 0.0  ;;  %v3743_v31 = vadd.f32 %v1542_v16, %v3691_v4 }
 0x735   : > { %v1537_v27 = vmax.f32 %v1520_v14, 0.0  ;;  %v1523_v11 = vpop.f32.mrb[24].mxu0  ;;  %v3737_v30 = vadd.f32 %v1543_v20, %v3685_v57 }
 0x736   : > { %v1544_v17 = vmul.f32 0.1, %v1536_v25  ;;  %v1524_v28 = vadd.f32 %v1523_v11, %v1426_v26  ;;  %v1525_v29 = vpop.f32.mrb[25].mxu0  ;;  %v1586_v11 = vpop.permute.xlu0 %1585 }
 0x737   : > { %v1545_v34 = vmul.f32 0.1, %v1537_v27  ;;  %v1526_v35 = vadd.f32 %v1525_v29, %v1426_v26 }
 0x738   : > { %v3734_v36 = vadd.f32 %v1544_v17, %v3682_v45  ;;  %v1538_v32 = vmax.f32 %v1524_v28, 0.0 }
 0x739   : > { %v3740_v40 = vadd.f32 %v1545_v34, %v3688_v0  ;;  %v1539_v44 = vmax.f32 %v1526_v35, 0.0  ;;  %v1529_v33 = vpop.f32.mrb[26].mxu0 }
 0x73a   : > { %v1530_v62 = vadd.f32 %v1529_v33, %v1431_v38  ;;  %v1531_v56 = vpop.f32.mrb[27].mxu0  ;;  %v2866_v5 = vpack.c.bf16 %v3734_v36, %v3743_v31  ;;  %v1546_v0 = vmul.f32 0.1, %v1538_v32 }
 0x73b   : > { %v1532_v3 = vadd.f32 %v1531_v56, %v1431_v38  ;;  %v2864_v45 = vpack.c.bf16 %v3740_v40, %v3737_v30  ;;  %v1547_v37 = vmul.f32 0.1, %v1539_v44 }
 0x73c   : > { %v1540_v57 = vmax.f32 %v1530_v62, 0.0  ;;  %v3759_v48 = vadd.f32 %v1546_v0, %v3707_v60 }
 0x73d   : > { %v1541_v22 = vmax.f32 %v1532_v3, 0.0  ;;  %2865 = vmatprep.subr.bf16.mxu1 %v2864_v45  ;;  %v3753_v46 = vadd.f32 %v1547_v37, %v3701_v54  ;;  %v2733_v54 = vld [vmem:[%s4092_s3 + $0xf8] sm:$0xff] }
 0x73e   : > { %v1548_v42 = vmul.f32 0.1, %v1540_v57  ;;  %2867 = vmatpush1.bf16.msra.mxu1 %v2866_v5 }
 0x73f   : > { %v1549_v6 = vmul.f32 0.1, %v1541_v22 }
 0x740   : > { %v3750_v4 = vadd.f32 %v1548_v42, %v3698_v43  ;;  %v2732_v43 = vld [vmem:[%s4092_s3 + $0xf0] sm:$0xff]  ;;  %v2742_v42 = vld [vmem:[%s4092_s3 + $0x100] sm:$0xff] }
 0x741   : > { %v3756_v39 = vadd.f32 %v1549_v6, %v3704_v49  ;;  %v1571_v49 = vpop.permute.xlu1 %1570  ;;  %v2743_v6 = vld [vmem:[%s4092_s3 + $0x108] sm:$0xff] }
 0x742   : > { %v2870_v41 = vpack.c.bf16 %v3750_v4, %v3759_v48 }
 0x743   : > { %v2868_v51 = vpack.c.bf16 %v3756_v39, %v3753_v46 }
 0x745   : > { %2869 = vmatprep.subr.bf16.mxu1 %v2868_v51  ;;  %v1581_v10 = vpop.permute.xlu1 %1580 }
 0x746   : > { %2871 = vmatpush1.bf16.msra.mxu1 %v2870_v41 }
 0x749   : > { %2738 = vmatmul.mubr.msk.f32.vlgmr.msra.gmra.mrb[28].mxu1 %vm502_vm0, %v2730_v52 }
 0x74a   : > { %1670 = vmatprep.mubr.f32.mxu1 %v3039_v18 }
 0x74d   : > { %2739 = vmatmul.mubr.msk.f32.gmra.mrb[30].mxu1 %vm502_vm0, %v2731_v47  ;;  %v1731_v47 = vpop.permute.xlu0 %1730 }
 0x74e   : > { %1676 = vmatprep.mubr.f32.mxu1 %v3039_v18 }
 0x751   : > { %2740 = vmatmul.mubr.msk.f32.gmra.mrb[32].mxu1 %vm502_vm0, %v2732_v43 }
 0x752   : > { %1682 = vmatprep.mubr.f32.mxu1 %v3039_v18 }
 0x755   : > { %2741 = vmatmul.mubr.msk.f32.gmra.mrb[34].mxu1 %vm502_vm0, %v2733_v54 }
 0x756   : > { %1974 = vmatprep.mubr.f32.mxu1 %v3039_v18 }
 0x81c   : > { %v1666_v60 = vpop.f32.mrb[28].mxu1 }
 0x81d   : > { %v1667_v2 = vadd.f32 %v1666_v60, %v1571_v49  ;;  %v1668_v50 = vpop.f32.mrb[29].mxu1 }
 0x81e   : > { %v1669_v7 = vadd.f32 %v1668_v50, %v1571_v49 }
 0x81f   : > { %v1689_v61 = vmax.f32 %v1667_v2, 0.0 }
 0x820   : > { %v1690_v53 = vmax.f32 %v1669_v7, 0.0  ;;  %v1672_v9 = vpop.f32.mrb[30].mxu1 }
 0x821   : > { %v1673_v12 = vadd.f32 %v1672_v9, %v1576_v59  ;;  %v1674_v15 = vpop.f32.mrb[31].mxu1  ;;  %v1697_v23 = vmul.f32 0.1, %v1689_v61 }
 0x822   : > { %v1675_v1 = vadd.f32 %v1674_v15, %v1576_v59  ;;  %v1698_v8 = vmul.f32 0.1, %v1690_v53 }
 0x823   : > { %v1691_v19 = vmax.f32 %v1673_v12, 0.0  ;;  %v3795_v34 = vadd.f32 %v1697_v23, %v3743_v31 }
 0x824   : > { %v1692_v21 = vmax.f32 %v1675_v1, 0.0  ;;  %v1678_v13 = vpop.f32.mrb[32].mxu1  ;;  %v3789_v16 = vadd.f32 %v1698_v8, %v3737_v30 }
 0x825   : > { %v1699_v24 = vmul.f32 0.1, %v1691_v19  ;;  %v1679_v14 = vadd.f32 %v1678_v13, %v1581_v10  ;;  %v1680_v25 = vpop.f32.mrb[33].mxu1  ;;  %v1741_v13 = vpop.permute.xlu0 %1740 }
 0x826   : > { %v1700_v26 = vmul.f32 0.1, %v1692_v21  ;;  %v1681_v20 = vadd.f32 %v1680_v25, %v1581_v10 }
 0x827   : > { %v3786_v27 = vadd.f32 %v1699_v24, %v3734_v36  ;;  %v1693_v35 = vmax.f32 %v1679_v14, 0.0 }
 0x828   : > { %v3792_v17 = vadd.f32 %v1700_v26, %v3740_v40  ;;  %v1694_v28 = vmax.f32 %v1681_v20, 0.0  ;;  %v1684_v29 = vpop.f32.mrb[34].mxu1 }
 0x829   : > { %v1685_v38 = vadd.f32 %v1684_v29, %v1586_v11  ;;  %v1686_v44 = vpop.f32.mrb[35].mxu1  ;;  %v2874_v32 = vpack.c.bf16 %v3786_v27, %v3795_v34  ;;  %v1701_v40 = vmul.f32 0.1, %v1693_v35 }
 0x82a   : > { %v1687_v33 = vadd.f32 %v1686_v44, %v1586_v11  ;;  %v2872_v36 = vpack.c.bf16 %v3792_v17, %v3789_v16  ;;  %v1702_v62 = vmul.f32 0.1, %v1694_v28 }
 0x82b   : > { %v1695_v30 = vmax.f32 %v1685_v38, 0.0  ;;  %v3811_v37 = vadd.f32 %v1701_v40, %v3759_v48 }
 0x82c   : > { %v1696_v56 = vmax.f32 %v1687_v33, 0.0  ;;  %2873 = vmatprep.subr.bf16.mxu0 %v2872_v36  ;;  %v3805_v5 = vadd.f32 %v1702_v62, %v3753_v46  ;;  %v2745_v46 = vld [vmem:[%s4092_s3 + $0x118] sm:$0xff] }
 0x82d   : > { %v1703_v3 = vmul.f32 0.1, %v1695_v30  ;;  %2875 = vmatpush1.bf16.msra.mxu0 %v2874_v32 }
 0x82e   : > { %v1704_v45 = vmul.f32 0.1, %v1696_v56 }
 0x82f   : > { %v3802_v31 = vadd.f32 %v1703_v3, %v3750_v4  ;;  %v2744_v4 = vld [vmem:[%s4092_s3 + $0x110] sm:$0xff]  ;;  %v2754_v3 = vld [vmem:[%s4092_s3 + $0x120] sm:$0xff] }
 0x830   : > { %v3808_v57 = vadd.f32 %v1704_v45, %v3756_v39  ;;  %v1726_v39 = vpop.permute.xlu1 %1725  ;;  %v2755_v45 = vld [vmem:[%s4092_s3 + $0x128] sm:$0xff] }
 0x831   : > { %v2878_v0 = vpack.c.bf16 %v3802_v31, %v3811_v37 }
 0x832   : > { %v2876_v22 = vpack.c.bf16 %v3808_v57, %v3805_v5 }
 0x834   : > { %2877 = vmatprep.subr.bf16.mxu0 %v2876_v22  ;;  %v1736_v59 = vpop.permute.xlu1 %1735 }
 0x835   : > { %2879 = vmatpush1.bf16.msra.mxu0 %v2878_v0 }
 0x838   : > { %2750 = vmatmul.mubr.msk.f32.vlgmr.msra.gmra.mrb[28].mxu0 %vm502_vm0, %v2742_v42 }
 0x839   : > { %1825 = vmatprep.mubr.f32.mxu0 %v3039_v18 }
 0x83c   : > { %2751 = vmatmul.mubr.msk.f32.gmra.mrb[30].mxu0 %vm502_vm0, %v2743_v6  ;;  %v1886_v6 = vpop.permute.xlu0 %1885 }
 0x83d   : > { %1831 = vmatprep.mubr.f32.mxu0 %v3039_v18 }
 0x840   : > { %2752 = vmatmul.mubr.msk.f32.gmra.mrb[32].mxu0 %vm502_vm0, %v2744_v4 }
 0x841   : > { %1837 = vmatprep.mubr.f32.mxu0 %v3039_v18 }
 0x844   : > { %2753 = vmatmul.mubr.msk.f32.gmra.mrb[34].mxu0 %vm502_vm0, %v2745_v46 }
 0x845   : > { %2129 = vmatprep.mubr.f32.mxu0 %v3039_v18 }
 0x90b   : > { %v1821_v48 = vpop.f32.mrb[28].mxu0 }
 0x90c   : > { %v1822_v51 = vadd.f32 %v1821_v48, %v1726_v39  ;;  %v1823_v41 = vpop.f32.mrb[29].mxu0 }
 0x90d   : > { %v1824_v52 = vadd.f32 %v1823_v41, %v1726_v39 }
 0x90e   : > { %v1844_v49 = vmax.f32 %v1822_v51, 0.0 }
 0x90f   : > { %v1845_v43 = vmax.f32 %v1824_v52, 0.0  ;;  %v1827_v54 = vpop.f32.mrb[30].mxu0 }
 0x910   : > { %v1828_v60 = vadd.f32 %v1827_v54, %v1731_v47  ;;  %v1829_v2 = vpop.f32.mrb[31].mxu0  ;;  %v1852_v12 = vmul.f32 0.1, %v1844_v49 }
 0x911   : > { %v1830_v50 = vadd.f32 %v1829_v2, %v1731_v47  ;;  %v1853_v53 = vmul.f32 0.1, %v1845_v43 }
 0x912   : > { %v1846_v7 = vmax.f32 %v1828_v60, 0.0  ;;  %v3847_v26 = vadd.f32 %v1852_v12, %v3795_v34 }
 0x913   : > { %v1847_v9 = vmax.f32 %v1830_v50, 0.0  ;;  %v1833_v61 = vpop.f32.mrb[32].mxu0  ;;  %v3841_v23 = vadd.f32 %v1853_v53, %v3789_v16 }
 0x914   : > { %v1854_v15 = vmul.f32 0.1, %v1846_v7  ;;  %v1834_v1 = vadd.f32 %v1833_v61, %v1736_v59  ;;  %v1835_v19 = vpop.f32.mrb[33].mxu0  ;;  %v1896_v61 = vpop.permute.xlu0 %1895 }
 0x915   : > { %v1855_v10 = vmul.f32 0.1, %v1847_v9  ;;  %v1836_v8 = vadd.f32 %v1835_v19, %v1736_v59 }
 0x916   : > { %v3838_v21 = vadd.f32 %v1854_v15, %v3786_v27  ;;  %v1848_v20 = vmax.f32 %v1834_v1, 0.0 }
 0x917   : > { %v3844_v24 = vadd.f32 %v1855_v10, %v3792_v17  ;;  %v1849_v14 = vmax.f32 %v1836_v8, 0.0  ;;  %v1839_v25 = vpop.f32.mrb[34].mxu0 }
 0x918   : > { %v1840_v11 = vadd.f32 %v1839_v25, %v1741_v13  ;;  %v1841_v28 = vpop.f32.mrb[35].mxu0  ;;  %v2882_v35 = vpack.c.bf16 %v3838_v21, %v3847_v26  ;;  %v1856_v17 = vmul.f32 0.1, %v1848_v20 }
 0x919   : > { %v1842_v29 = vadd.f32 %v1841_v28, %v1741_v13  ;;  %v2880_v27 = vpack.c.bf16 %v3844_v24, %v3841_v23  ;;  %v1857_v38 = vmul.f32 0.1, %v1849_v14 }
 0x91a   : > { %v1850_v16 = vmax.f32 %v1840_v11, 0.0  ;;  %v3863_v62 = vadd.f32 %v1856_v17, %v3811_v37 }
 0x91b   : > { %v1851_v44 = vmax.f32 %v1842_v29, 0.0  ;;  %2881 = vmatprep.subr.bf16.mxu1 %v2880_v27  ;;  %v3857_v32 = vadd.f32 %v1857_v38, %v3805_v5  ;;  %v2757_v5 = vld [vmem:[%s4092_s3 + $0x138] sm:$0xff] }
 0x91c   : > { %v1858_v33 = vmul.f32 0.1, %v1850_v16  ;;  %2883 = vmatpush1.bf16.msra.mxu1 %v2882_v35 }
 0x91d   : > { %v1859_v36 = vmul.f32 0.1, %v1851_v44 }
 0x91e   : > { %v3854_v34 = vadd.f32 %v1858_v33, %v3802_v31  ;;  %v2756_v31 = vld [vmem:[%s4092_s3 + $0x130] sm:$0xff]  ;;  %v2766_v33 = vld [vmem:[%s4092_s3 + $0x140] sm:$0xff] }
 0x91f   : > { %v3860_v30 = vadd.f32 %v1859_v36, %v3808_v57  ;;  %v1881_v57 = vpop.permute.xlu1 %1880  ;;  %v2767_v36 = vld [vmem:[%s4092_s3 + $0x148] sm:$0xff] }
 0x920   : > { %v2886_v40 = vpack.c.bf16 %v3854_v34, %v3863_v62 }
 0x921   : > { %v2884_v56 = vpack.c.bf16 %v3860_v30, %v3857_v32 }
 0x923   : > { %2885 = vmatprep.subr.bf16.mxu1 %v2884_v56  ;;  %v1891_v47 = vpop.permute.xlu1 %1890 }
 0x924   : > { %2887 = vmatpush1.bf16.msra.mxu1 %v2886_v40 }
 0x927   : > { %2762 = vmatmul.mubr.msk.f32.vlgmr.msra.gmra.mrb[36].mxu1 %vm502_vm0, %v2754_v3 }
 0x928   : > { %1980 = vmatprep.mubr.f32.mxu1 %v3039_v18 }
 0x92b   : > { %2763 = vmatmul.mubr.msk.f32.gmra.mrb[38].mxu1 %vm502_vm0, %v2755_v45  ;;  %v2041_v45 = vpop.permute.xlu0 %2040 }
 0x92c   : > { %1986 = vmatprep.mubr.f32.mxu1 %v3039_v18 }
 0x92f   : > { %2764 = vmatmul.mubr.msk.f32.gmra.mrb[40].mxu1 %vm502_vm0, %v2756_v31 }
 0x930   : > { %1992 = vmatprep.mubr.f32.mxu1 %v3039_v18 }
 0x933   : > { %2765 = vmatmul.mubr.msk.f32.gmra.mrb[42].mxu1 %vm502_vm0, %v2757_v5 }
 0x934   : > { %2284 = vmatprep.mubr.f32.mxu1 %v3039_v18 }
 0x9fa   : > { %v1976_v37 = vpop.f32.mrb[36].mxu1 }
 0x9fb   : > { %v1977_v22 = vadd.f32 %v1976_v37, %v1881_v57  ;;  %v1978_v0 = vpop.f32.mrb[37].mxu1 }
 0x9fc   : > { %v1979_v42 = vadd.f32 %v1978_v0, %v1881_v57 }
 0x9fd   : > { %v1999_v39 = vmax.f32 %v1977_v22, 0.0 }
 0x9fe   : > { %v2000_v4 = vmax.f32 %v1979_v42, 0.0  ;;  %v1982_v46 = vpop.f32.mrb[38].mxu1 }
 0x9ff   : > { %v1983_v48 = vadd.f32 %v1982_v46, %v1886_v6  ;;  %v1984_v51 = vpop.f32.mrb[39].mxu1  ;;  %v2007_v60 = vmul.f32 0.1, %v1999_v39 }
 0xa00   : > { %v1985_v41 = vadd.f32 %v1984_v51, %v1886_v6  ;;  %v2008_v43 = vmul.f32 0.1, %v2000_v4 }
 0xa01   : > { %v2001_v52 = vmax.f32 %v1983_v48, 0.0  ;;  %v3899_v10 = vadd.f32 %v2007_v60, %v3847_v26 }
 0xa02   : > { %v2002_v54 = vmax.f32 %v1985_v41, 0.0  ;;  %v1988_v49 = vpop.f32.mrb[40].mxu1  ;;  %v3893_v12 = vadd.f32 %v2008_v43, %v3841_v23 }
 0xa03   : > { %v2009_v2 = vmul.f32 0.1, %v2001_v52  ;;  %v1989_v50 = vadd.f32 %v1988_v49, %v1891_v47  ;;  %v1990_v7 = vpop.f32.mrb[41].mxu1  ;;  %v2051_v49 = vpop.permute.xlu0 %2050 }
 0xa04   : > { %v2010_v59 = vmul.f32 0.1, %v2002_v54  ;;  %v1991_v53 = vadd.f32 %v1990_v7, %v1891_v47 }
 0xa05   : > { %v3890_v9 = vadd.f32 %v2009_v2, %v3838_v21  ;;  %v2003_v8 = vmax.f32 %v1989_v50, 0.0 }
 0xa06   : > { %v3896_v15 = vadd.f32 %v2010_v59, %v3844_v24  ;;  %v2004_v1 = vmax.f32 %v1991_v53, 0.0  ;;  %v1994_v19 = vpop.f32.mrb[42].mxu1 }
 0xa07   : > { %v1995_v13 = vadd.f32 %v1994_v19, %v1896_v61  ;;  %v1996_v14 = vpop.f32.mrb[43].mxu1  ;;  %v2890_v20 = vpack.c.bf16 %v3890_v9, %v3899_v10  ;;  %v2011_v24 = vmul.f32 0.1, %v2003_v8 }
 0xa08   : > { %v1997_v25 = vadd.f32 %v1996_v14, %v1896_v61  ;;  %v2888_v21 = vpack.c.bf16 %v3896_v15, %v3893_v12  ;;  %v2012_v11 = vmul.f32 0.1, %v2004_v1 }
 0xa09   : > { %v2005_v23 = vmax.f32 %v1995_v13, 0.0  ;;  %v3915_v38 = vadd.f32 %v2011_v24, %v3863_v62 }
 0xa0a   : > { %v2006_v28 = vmax.f32 %v1997_v25, 0.0  ;;  %2889 = vmatprep.subr.bf16.mxu0 %v2888_v21  ;;  %v3909_v35 = vadd.f32 %v2012_v11, %v3857_v32  ;;  %v2769_v32 = vld [vmem:[%s4092_s3 + $0x158] sm:$0xff] }
 0xa0b   : > { %v2013_v29 = vmul.f32 0.1, %v2005_v23  ;;  %2891 = vmatpush1.bf16.msra.mxu0 %v2890_v20 }
 0xa0c   : > { %v2014_v27 = vmul.f32 0.1, %v2006_v28 }
 0xa0d   : > { %v3906_v26 = vadd.f32 %v2013_v29, %v3854_v34  ;;  %v2768_v34 = vld [vmem:[%s4092_s3 + $0x150] sm:$0xff]  ;;  %v2778_v29 = vld [vmem:[%s4092_s3 + $0x160] sm:$0xff] }
 0xa0e   : > { %v3912_v16 = vadd.f32 %v2014_v27, %v3860_v30  ;;  %v2036_v30 = vpop.permute.xlu1 %2035  ;;  %v2779_v27 = vld [vmem:[%s4092_s3 + $0x168] sm:$0xff] }
 0xa0f   : > { %v2894_v17 = vpack.c.bf16 %v3906_v26, %v3915_v38 }
 0xa10   : > { %v2892_v44 = vpack.c.bf16 %v3912_v16, %v3909_v35 }
 0xa12   : > { %2893 = vmatprep.subr.bf16.mxu0 %v2892_v44  ;;  %v2046_v6 = vpop.permute.xlu1 %2045 }
 0xa13   : > { %2895 = vmatpush1.bf16.msra.mxu0 %v2894_v17 }
 0xa16   : > { %2774 = vmatmul.mubr.msk.f32.vlgmr.msra.gmra.mrb[36].mxu0 %vm502_vm0, %v2766_v33 }
 0xa17   : > { %2135 = vmatprep.mubr.f32.mxu0 %v3039_v18 }
 0xa1a   : > { %2775 = vmatmul.mubr.msk.f32.gmra.mrb[38].mxu0 %vm502_vm0, %v2767_v36  ;;  %v2196_v36 = vpop.permute.xlu0 %2195 }
 0xa1b   : > { %2141 = vmatprep.mubr.f32.mxu0 %v3039_v18 }
 0xa1e   : > { %2776 = vmatmul.mubr.msk.f32.gmra.mrb[40].mxu0 %vm502_vm0, %v2768_v34 }
 0xa1f   : > { %2147 = vmatprep.mubr.f32.mxu0 %v3039_v18 }
 0xa22   : > { %2777 = vmatmul.mubr.msk.f32.gmra.mrb[42].mxu0 %vm502_vm0, %v2769_v32 }
 0xa23   : > { %2439 = vmatprep.mubr.f32.mxu0 %v3039_v18 }
 0xae9   : > { %v2131_v62 = vpop.f32.mrb[36].mxu0 }
 0xaea   : > { %v2132_v56 = vadd.f32 %v2131_v62, %v2036_v30  ;;  %v2133_v40 = vpop.f32.mrb[37].mxu0 }
 0xaeb   : > { %v2134_v3 = vadd.f32 %v2133_v40, %v2036_v30 }
 0xaec   : > { %v2154_v57 = vmax.f32 %v2132_v56, 0.0 }
 0xaed   : > { %v2155_v31 = vmax.f32 %v2134_v3, 0.0  ;;  %v2137_v5 = vpop.f32.mrb[38].mxu0 }
 0xaee   : > { %v2138_v37 = vadd.f32 %v2137_v5, %v2041_v45  ;;  %v2139_v22 = vpop.f32.mrb[39].mxu0  ;;  %v2162_v48 = vmul.f32 0.1, %v2154_v57 }
 0xaef   : > { %v2140_v0 = vadd.f32 %v2139_v22, %v2041_v45  ;;  %v2163_v4 = vmul.f32 0.1, %v2155_v31 }
 0xaf0   : > { %v2156_v42 = vmax.f32 %v2138_v37, 0.0  ;;  %v3951_v59 = vadd.f32 %v2162_v48, %v3899_v10 }
 0xaf1   : > { %v2157_v46 = vmax.f32 %v2140_v0, 0.0  ;;  %v2143_v39 = vpop.f32.mrb[40].mxu0  ;;  %v3945_v60 = vadd.f32 %v2163_v4, %v3893_v12 }
 0xaf2   : > { %v2164_v51 = vmul.f32 0.1, %v2156_v42  ;;  %v2144_v41 = vadd.f32 %v2143_v39, %v2046_v6  ;;  %v2145_v52 = vpop.f32.mrb[41].mxu0  ;;  %v2206_v39 = vpop.permute.xlu0 %2205 }
 0xaf3   : > { %v2165_v47 = vmul.f32 0.1, %v2157_v46  ;;  %v2146_v43 = vadd.f32 %v2145_v52, %v2046_v6 }
 0xaf4   : > { %v3942_v54 = vadd.f32 %v2164_v51, %v3890_v9  ;;  %v2158_v53 = vmax.f32 %v2144_v41, 0.0 }
 0xaf5   : > { %v3948_v2 = vadd.f32 %v2165_v47, %v3896_v15  ;;  %v2159_v50 = vmax.f32 %v2146_v43, 0.0  ;;  %v2149_v7 = vpop.f32.mrb[42].mxu0 }
 0xaf6   : > { %v2150_v61 = vadd.f32 %v2149_v7, %v2051_v49  ;;  %v2151_v1 = vpop.f32.mrb[43].mxu0  ;;  %v2898_v8 = vpack.c.bf16 %v3942_v54, %v3951_v59  ;;  %v2166_v15 = vmul.f32 0.1, %v2158_v53 }
 0xaf7   : > { %v2152_v19 = vadd.f32 %v2151_v1, %v2051_v49  ;;  %v2896_v9 = vpack.c.bf16 %v3948_v2, %v3945_v60  ;;  %v2167_v13 = vmul.f32 0.1, %v2159_v50 }
 0xaf8   : > { %v2160_v12 = vmax.f32 %v2150_v61, 0.0  ;;  %v3967_v11 = vadd.f32 %v2166_v15, %v3915_v38 }
 0xaf9   : > { %v2161_v14 = vmax.f32 %v2152_v19, 0.0  ;;  %2897 = vmatprep.subr.bf16.mxu1 %v2896_v9  ;;  %v3961_v20 = vadd.f32 %v2167_v13, %v3909_v35  ;;  %v2781_v35 = vld [vmem:[%s4092_s3 + $0x178] sm:$0xff] }
 0xafa   : > { %v2168_v25 = vmul.f32 0.1, %v2160_v12  ;;  %2899 = vmatpush1.bf16.msra.mxu1 %v2898_v8 }
 0xafb   : > { %v2169_v21 = vmul.f32 0.1, %v2161_v14 }
 0xafc   : > { %v3958_v10 = vadd.f32 %v2168_v25, %v3906_v26  ;;  %v2780_v26 = vld [vmem:[%s4092_s3 + $0x170] sm:$0xff]  ;;  %v2790_v25 = vld [vmem:[%s4092_s3 + $0x180] sm:$0xff] }
 0xafd   : > { %v3964_v23 = vadd.f32 %v2169_v21, %v3912_v16  ;;  %v2191_v16 = vpop.permute.xlu1 %2190  ;;  %v2791_v21 = vld [vmem:[%s4092_s3 + $0x188] sm:$0xff] }
 0xafe   : > { %v2902_v24 = vpack.c.bf16 %v3958_v10, %v3967_v11 }
 0xaff   : > { %v2900_v28 = vpack.c.bf16 %v3964_v23, %v3961_v20 }
 0xb01   : > { %2901 = vmatprep.subr.bf16.mxu1 %v2900_v28  ;;  %v2201_v45 = vpop.permute.xlu1 %2200 }
 0xb02   : > { %2903 = vmatpush1.bf16.msra.mxu1 %v2902_v24 }
 0xb05   : > { %2786 = vmatmul.mubr.msk.f32.vlgmr.msra.gmra.mrb[44].mxu1 %vm502_vm0, %v2778_v29 }
 0xb06   : > { %2290 = vmatprep.mubr.f32.mxu1 %v3039_v18 }
 0xb09   : > { %2787 = vmatmul.mubr.msk.f32.gmra.mrb[46].mxu1 %vm502_vm0, %v2779_v27 }
 0xb0a   : > { %2296 = vmatprep.mubr.f32.mxu1 %v3039_v18 }
 0xb0d   : > { %2788 = vmatmul.mubr.msk.f32.gmra.mrb[48].mxu1 %vm502_vm0, %v2780_v26 }
 0xb0e   : > { %2302 = vmatprep.mubr.f32.mxu1 %v3039_v18 }
 0xb11   : > { %2789 = vmatmul.mubr.msk.f32.gmra.mrb[50].mxu1 %vm502_vm0, %v2781_v35 }
 0xbd8   : > { %v2286_v38 = vpop.f32.mrb[44].mxu1 }
 0xbd9   : > { %v2287_v44 = vadd.f32 %v2286_v38, %v2191_v16  ;;  %v2288_v17 = vpop.f32.mrb[45].mxu1 }
 0xbda   : > { %v2289_v33 = vadd.f32 %v2288_v17, %v2191_v16 }
 0xbdb   : > { %v2309_v30 = vmax.f32 %v2287_v44, 0.0 }
 0xbdc   : > { %v2310_v34 = vmax.f32 %v2289_v33, 0.0  ;;  %v2292_v32 = vpop.f32.mrb[46].mxu1 }
 0xbdd   : > { %v2293_v62 = vadd.f32 %v2292_v32, %v2196_v36  ;;  %v2294_v56 = vpop.f32.mrb[47].mxu1  ;;  %v2317_v37 = vmul.f32 0.1, %v2309_v30 }
 0xbde   : > { %v2295_v40 = vadd.f32 %v2294_v56, %v2196_v36  ;;  %v2318_v31 = vmul.f32 0.1, %v2310_v34 }
 0xbdf   : > { %v2311_v3 = vmax.f32 %v2293_v62, 0.0  ;;  %v2325_v47 = vadd.f32 %v2317_v37, %v3951_v59 }
 0xbe0   : > { %v2312_v5 = vmax.f32 %v2295_v40, 0.0  ;;  %v2298_v57 = vpop.f32.mrb[48].mxu1  ;;  %v2326_v48 = vadd.f32 %v2318_v31, %v3945_v60 }
 0xbe1   : > { %v2319_v22 = vmul.f32 0.1, %v2311_v3  ;;  %v2299_v0 = vadd.f32 %v2298_v57, %v2201_v45  ;;  %v2300_v42 = vpop.f32.mrb[49].mxu1 }
 0xbe2   : > { %v2320_v6 = vmul.f32 0.1, %v2312_v5  ;;  %v2301_v4 = vadd.f32 %v2300_v42, %v2201_v45 }
 0xbe3   : > { %v3993_v46 = vadd.f32 %v2319_v22, %v3942_v54  ;;  %v2313_v43 = vmax.f32 %v2299_v0, 0.0 }
 0xbe4   : > { %v3997_v51 = vadd.f32 %v2320_v6, %v3948_v2  ;;  %v2314_v41 = vmax.f32 %v2301_v4, 0.0  ;;  %v2304_v52 = vpop.f32.mrb[50].mxu1 }
 0xbe5   : > { %v2305_v49 = vadd.f32 %v2304_v52, %v2206_v39  ;;  %v2306_v50 = vpop.f32.mrb[51].mxu1  ;;  %v2906_v61 = vpack.c.bf16 %v3993_v46, %v2325_v47  ;;  %v2321_v60 = vmul.f32 0.1, %v2313_v43 }
 0xbe6   : > { %v2307_v7 = vadd.f32 %v2306_v50, %v2206_v39  ;;  %v2904_v53 = vpack.c.bf16 %v3997_v51, %v2326_v48  ;;  %v2322_v1 = vmul.f32 0.1, %v2314_v41 }
 0xbe7   : > { %v2315_v54 = vmax.f32 %v2305_v49, 0.0  ;;  %v2329_v13 = vadd.f32 %v2321_v60, %v3967_v11  ;;  %v2351_v11 = vpop.permute.xlu0 %2350 }
 0xbe8   : > { %v2316_v19 = vmax.f32 %v2307_v7, 0.0  ;;  %2905 = vmatprep.subr.bf16.mxu0 %v2904_v53  ;;  %v4006_v59 = vadd.f32 %v2322_v1, %v3961_v20  ;;  %v2793_v20 = vld [vmem:[%s4092_s3 + $0x198] sm:$0xff] }
 0xbe9   : > { %v2323_v9 = vmul.f32 0.1, %v2315_v54  ;;  %2907 = vmatpush1.bf16.msra.mxu0 %v2906_v61 }
 0xbea   : > { %v2324_v2 = vmul.f32 0.1, %v2316_v19 }
 0xbeb   : > { %v4003_v8 = vadd.f32 %v2323_v9, %v3958_v10  ;;  %v2792_v10 = vld [vmem:[%s4092_s3 + $0x190] sm:$0xff] }
 0xbec   : > { %v4009_v12 = vadd.f32 %v2324_v2, %v3964_v23  ;;  %v2346_v23 = vpop.permute.xlu1 %2345 }
 0xbed   : > { %v2910_v15 = vpack.c.bf16 %v4003_v8, %v2329_v13 }
 0xbee   : > { %v2908_v14 = vpack.c.bf16 %v4009_v12, %v4006_v59 }
 0xbf0   : > { %2909 = vmatprep.subr.bf16.mxu0 %v2908_v14  ;;  %v2356_v35 = vpop.permute.xlu1 %2355 }
 0xbf1   : > { %2911 = vmatpush1.bf16.msra.mxu0 %v2910_v15 }
 0xbf4   : > { %2798 = vmatmul.mubr.msk.f32.vlgmr.msra.gmra.mrb[44].mxu0 %vm502_vm0, %v2790_v25  ;;  %v2495_v31 = vpop.permute.xlu1 %2494 }
 0xbf5   : > { %2445 = vmatprep.mubr.f32.mxu0 %v3039_v18 }
 0xbf8   : > { %2799 = vmatmul.mubr.msk.f32.gmra.mrb[46].mxu0 %vm502_vm0, %v2791_v21  ;;  %v2505_v19 = vpop.permute.xlu1 %2504 }
 0xbf9   : > { %2451 = vmatprep.mubr.f32.mxu0 %v3039_v18 }
 0xbfc   : > { %2800 = vmatmul.mubr.msk.f32.gmra.mrb[48].mxu0 %vm502_vm0, %v2792_v10 }
 0xbfd   : > { %2457 = vmatprep.mubr.f32.mxu0 %v3039_v18  ;;  %v2361_v18 = vpop.permute.xlu0 %2360 }
 0xc00   : > { %2801 = vmatmul.mubr.msk.f32.gmra.mrb[50].mxu0 %vm502_vm0, %v2793_v20 }
 0xc01   : > { %v2500_v42 = vpop.permute.xlu0 %2499 }
 0xc05   : > { %v2510_v10 = vpop.permute.xlu0 %2509 }
 0xcc7   : > { %v2441_v28 = vpop.f32.mrb[44].mxu0 }
 0xcc8   : > { %v2442_v24 = vadd.f32 %v2441_v28, %v2346_v23  ;;  %v2443_v29 = vpop.f32.mrb[45].mxu0 }
 0xcc9   : > { %v2444_v27 = vadd.f32 %v2443_v29, %v2346_v23 }
 0xcca   : > { %v2464_v26 = vmax.f32 %v2442_v24, 0.0 }
 0xccb   : > { %v2465_v16 = vmax.f32 %v2444_v27, 0.0  ;;  %v2447_v38 = vpop.f32.mrb[46].mxu0 }
 0xccc   : > { %v2472_v44 = vmul.f32 0.1, %v2464_v26  ;;  %v2448_v17 = vadd.f32 %v2447_v38, %v2351_v11  ;;  %v2449_v33 = vpop.f32.mrb[47].mxu0  ;;  %v3040_v38 = vmov 1966171168  }
 0xccd   : > { %v2473_v36 = vmul.f32 0.1, %v2465_v16  ;;  %v2450_v34 = vadd.f32 %v2449_v33, %v2351_v11 }
 0xcce   : > { %v2466_v32 = vmax.f32 %v2448_v17, 0.0  ;;  %v2480_v56 = vadd.f32 %v2472_v44, %v2325_v47  ;;  %v2554_v44 = vunpack.c.l.s4 %v3040_v38 }
 0xccf   : > { %v2467_v30 = vmax.f32 %v2450_v34, 0.0  ;;  %v2453_v62 = vpop.f32.mrb[48].mxu0  ;;  %v2481_v5 = vadd.f32 %v2473_v36, %v2326_v48 }
 0xcd0   : > { %v2474_v40 = vmul.f32 0.1, %v2466_v32  ;;  %v2454_v3 = vadd.f32 %v2453_v62, %v2356_v35  ;;  %v2455_v45 = vpop.f32.mrb[49].mxu0  ;;  %v2512_v41 = vmul.f32 %v2495_v31, %v2480_v56  ;;  %v2555_v36 = vunpack.c.0.s8 %v2554_v44 }
 0xcd1   : > { %v2475_v57 = vmul.f32 0.1, %v2467_v30  ;;  %v2456_v37 = vadd.f32 %v2455_v45, %v2356_v35  ;;  %v2513_v50 = vmul.f32 %v2495_v31, %v2481_v5 }
 0xcd2   : > { %v2482_v22 = vadd.f32 %v2474_v40, %v3993_v46  ;;  %v2468_v0 = vmax.f32 %v2454_v3, 0.0  ;;  %v2558_v40 = vsub.s32 %v2555_v36, %v3293_v58 }
 0xcd3   : > { %v2483_v6 = vadd.f32 %v2475_v57, %v3997_v51  ;;  %v2469_v4 = vmax.f32 %v2456_v37, 0.0  ;;  %v2459_v39 = vpop.f32.mrb[50].mxu0 }
 0xcd4   : > { %v2514_v52 = vmul.f32 %v2500_v42, %v2482_v22  ;;  %v2476_v43 = vmul.f32 0.1, %v2468_v0  ;;  %v2460_v49 = vadd.f32 %v2459_v39, %v2361_v18  ;;  %v2461_v47 = vpop.f32.mrb[51].mxu0 }
 0xcd5   : > { %v2515_v7 = vmul.f32 %v2500_v42, %v2483_v6  ;;  %v2477_v53 = vmul.f32 0.1, %v2469_v4  ;;  %v2462_v61 = vadd.f32 %v2461_v47, %v2361_v18 }
 0xcd6   : > { %v2520_v48 = vadd.f32 %v2514_v52, %v2512_v41  ;;  %v2484_v54 = vadd.f32 %v2476_v43, %v2329_v13  ;;  %v2470_v1 = vmax.f32 %v2460_v49, 0.0 }
 0xcd7   : > { %v2529_v46 = vadd.f32 %v2515_v7, %v2513_v50  ;;  %v2485_v60 = vadd.f32 %v2477_v53, %v4006_v59  ;;  %v2471_v9 = vmax.f32 %v2462_v61, 0.0 }
 0xcd8   : > { %v2516_v51 = vmul.f32 %v2505_v19, %v2484_v54  ;;  %v2478_v2 = vmul.f32 0.1, %v2470_v1 }
 0xcd9   : > { %v2517_v14 = vmul.f32 %v2505_v19, %v2485_v60  ;;  %v2479_v15 = vmul.f32 0.1, %v2471_v9 }
 0xcda   : > { %v2521_v25 = vadd.f32 %v2520_v48, %v2516_v51  ;;  %v2486_v21 = vadd.f32 %v2478_v2, %v4003_v8  ;;  %v2542_v8 = vpop.permute.xlu1 %2541 }
 0xcdb   : > { %v2530_v20 = vadd.f32 %v2529_v46, %v2517_v14  ;;  %v2487_v23 = vadd.f32 %v2479_v15, %v4009_v12  ;;  %v2547_v34 = vrot.slane %v2542_v8, %v3305_v63 }
 0xcdc   : > { %v2518_v11 = vmul.f32 %v2510_v10, %v2486_v21 }
 0xcdd   : > { %v2519_v13 = vmul.f32 %v2510_v10, %v2487_v23 }
 0xcde   : > { %v2522_v28 = vadd.f32 %v2521_v25, %v2518_v11 }
 0xcdf   : > { %v2531_v24 = vadd.f32 %v2530_v20, %v2519_v13 }
 0xce0   : > { %v2523_v29 = vrot.slane %v2522_v28, 4 }
 0xce1   : > { %v2532_v27 = vrot.slane %v2531_v24, 4 }
 0xce2   : > { %v2524_v59 = vadd.f32 %v2523_v29, %v2522_v28 }
 0xce3   : > { %v2533_v26 = vadd.f32 %v2532_v27, %v2531_v24 }
 0xce4   : > { %v2525_v35 = vrot.slane %v2524_v59, 2 }
 0xce5   : > { %v2534_v16 = vrot.slane %v2533_v26, 2 }
 0xce6   : > { %v2526_v17 = vadd.f32 %v2525_v35, %v2524_v59 }
 0xce7   : > { %v2535_v33 = vadd.f32 %v2534_v16, %v2533_v26 }
 0xce8   : > { %v2527_v18 = vrot.slane %v2526_v17, 1 }
 0xce9   : > { %v2536_v12 = vrot.slane %v2535_v33, 1 }
 0xcea   : > { %v2528_v32 = vadd.f32 %v2527_v18, %v2526_v17 }
 0xceb   : > { %v2537_v30 = vadd.f32 %v2536_v12, %v2535_v33 }
 0xcec   : > { %v2548_v62 = vadd.f32 %v2547_v34, %v2528_v32 }
 0xced   : > { %v2549_v56 = vadd.f32 %v2547_v34, %v2537_v30 }
 0xcef   : > { %v2552_v3 = vcombine.low %v2548_v62, %v2549_v56 }
 0xcf1   : > { %v2559_v45 = vrot.slane %v2552_v3, %v2558_v40 }
 0xcf3   : > { %v2566_v31 = vrot.slane %v2559_v45, %v2558_v40 }
 0xcf5   : > { %2572 = vst.msk [vmem:[%s274_s14] sm:$0x3] %vm2570_vm1, %v2566_v31 }
 0xcf6   : > { %2985 = shalt.err (!%p2982_p3)
}
 0xcf7   : > { %s2986_s23 = scalar_lea.hbm %s4047_s19, 32  ;;  %s2990_s30 = scalar_lea.hbm %s4096_s7, 64 }
 0xcf8   : > { %p2987_p4 = scmp.ne.s32.totalorder %s4047_s19, %s2986_s23  ;;  %p2991_p9 = scmp.lt.u32.totalorder %s4047_s19, %s4096_s7 }
 0xcf9   : > { %p2992_p10 = scmp.lt.u32.totalorder %s2990_s30, %s2986_s23  ;;  %p2994_p12 = scmp.lt.u32.totalorder %s2986_s23, %s4047_s19 }
 0xcfa   : > { %p2988_p7 = pnand %p2987_p4, %p3123_p5 }
 0xcfb   : > { %p2993_p11 = por %p2992_p10, %p2991_p9 }
 0xcfc   : > { %p2989_p8 = pneg %p2988_p7 }
 0xcfd   : > { %p2995_p13 = por %p2994_p12, %p2993_p11 }
 0xcff   : > { %p2996_p0 = pnand %p2995_p13, %p2989_p8 }
 0xd01   : > { %2999 = shalt.err (!%p2996_p0)
}
 0xd02   : > { %2916 = dma.vmem_to_hbm [thread:$0]  (%p3123_p5), %s4049_s15, 32, %s4047_s19, %s2574_s20  }
 0xd03 PF: > { %p2922_p1 = scmp.ge.s32.totalorder %s3034_s29, 2  ;;  %s2600_s14 = sand.u32 1, %s3022_s26  }
 0xd04   : > { %s2601_s17 = scalar_lea.sflag [#allocation4], %s2600_s14 }
 0xd05   : > { %p2919_p2 = pnand %p2922_p1, %p3127_p6 }
 0xd07   : > { %3017 = dma.done.wait (!%p2919_p2), %s2601_s17, 32  }
 0xd08   : > { %3019 = vsyncadd (!%p2919_p2), %s2601_s17, 4294967264  ;;  %p19_p3 = scmp.ge.s32.totalorder %s3110_s8, 4   ;;  %s4099_s26 = smov %s3026_s27 }
 0xd09   : > { %s4100_s27 = smov %s3030_s28  ;;  %s4101_s28 = smov %s3121_s11 }
 0xd0a   : > { %s4102_s29 = smov %s3110_s8  ;;  %21 = sbr.rel (!%p19_p3) target bundleno = 6 (0x6), region = 107 }
 0xd11   :  { %2606 = vsyncpa [#allocation4], 1 }
 0xd12   :  { %2608 = vsyncpa [#allocation4 + $0x1], 1 }

</bundles_post_ra>
